<compile_context>
chip_gen: v5e
topology: v5e:2x2
jax: 0.10.0
libtpu: 0.0.40
codegen_flags: <defaults>
</compile_context>

<pallas_src>
from functools import partial
import math

import numpy as np
import jax
import jax.numpy as jnp
from jax.experimental import pallas as pl
from jax.experimental.pallas import tpu as pltpu

# ----------------------------- config (small) -----------------------------
IMG_SIZE = 16
PATCH = 4
IN_CHANS = 3
EMBED_DIM = 32
DEPTH = 2
NUM_HEADS = 4
DEC_DIM = 32
DEC_DEPTH = 2
DEC_NUM_HEADS = 4
MLP_RATIO = 4.0
MASK_RATIO = 0.75

GRID_SIZE = IMG_SIZE // PATCH
NUM_PATCHES = GRID_SIZE * GRID_SIZE
PATCH_DIM = PATCH * PATCH * IN_CHANS
PRED_PAD = 128                     # lane-dense padded width for decoder prediction head

# Optional bf16 MXU fast path (v6e / v7x).  Default False -> exact f32 reference math.
USE_BF16_MATMUL = False

BLOCK_KEYS = ('ln1_w', 'ln1_b', 'qkv_w', 'qkv_b', 'proj_w', 'proj_b',
              'ln2_w', 'ln2_b', 'fc1_w', 'fc1_b', 'fc2_w', 'fc2_b')


def _round_up(x, m):
    return ((x + m - 1) // m) * m


# ------------------------- in-kernel math helpers -------------------------
def _erf(x):
    # Abramowitz & Stegun 7.1.26 rational approx (|err| < 1.5e-7).
    a1, a2, a3, a4, a5 = 0.254829592, -0.284496736, 1.421413741, -1.453152027, 1.061405429
    sign = jnp.where(x >= 0.0, 1.0, -1.0)
    ax = jnp.abs(x)
    t = 1.0 / (1.0 + 0.3275911 * ax)
    poly = ((((a5 * t + a4) * t + a3) * t + a2) * t + a1) * t
    return sign * (1.0 - poly * jnp.exp(-ax * ax))


def _gelu(x):
    return 0.5 * x * (1.0 + _erf(x * (1.0 / math.sqrt(2.0))))


def _layernorm(x, w, b, eps=1e-5):
    mu = jnp.mean(x, axis=-1, keepdims=True)
    var = jnp.mean((x - mu) ** 2, axis=-1, keepdims=True)
    return (x - mu) / jnp.sqrt(var + eps) * w + b


def _mm(a, b):
    if USE_BF16_MATMUL:
        a = a.astype(jnp.bfloat16)
        b = b.astype(jnp.bfloat16)
    return jnp.dot(a, b, preferred_element_type=jnp.float32)


def _transformer_block(x, wts, attn_bias, num_heads):
    """Pre-norm timm Block.  attn_bias masks padded key columns (-1e30)."""
    (ln1w, ln1b, qkvw, qkvb, projw, projb,
     ln2w, ln2b, fc1w, fc1b, fc2w, fc2b) = wts
    Lp, D = x.shape
    dh = D // num_heads

    # --- attention (heads batched; 1/sqrt(dh) pre-folded into qkv weights) ---
    h = _layernorm(x, ln1w, ln1b)
    qkv = _mm(h, qkvw) + qkvb                                   # (Lp, 3D)
    q = qkv[:, :D].reshape(Lp, num_heads, dh)
    k = qkv[:, D:2 * D].reshape(Lp, num_heads, dh)
    v = qkv[:, 2 * D:3 * D].reshape(Lp, num_heads, dh)
    s = jnp.einsum('qhd,khd->hqk', q, k, preferred_element_type=jnp.float32)
    s = s + attn_bias                                           # (1,Lp,Lp) broadcast
    s = s - jnp.max(s, axis=-1, keepdims=True)
    p = jnp.exp(s)
    p = p / jnp.sum(p, axis=-1, keepdims=True)
    o = jnp.einsum('hqk,khd->qhd', p, v, preferred_element_type=jnp.float32)
    a = _mm(o.reshape(Lp, D), projw) + projb
    x = x + a

    # --- MLP ---
    h2 = _layernorm(x, ln2w, ln2b)
    h2 = _mm(h2, fc1w) + fc1b
    h2 = _gelu(h2)
    h2 = _mm(h2, fc2w) + fc2b
    return x + h2


# ------------------------------ fused kernels ------------------------------
def encoder_stack_kernel(*refs, depth, num_heads, n_valid):
    # refs: xk, add, patch_w, 12 stacked block weights, norm_w, norm_b, dec_w, dec_b, out
    xk_ref, add_ref, patch_w_ref = refs[0], refs[1], refs[2]
    blk_refs = refs[3:3 + 12]
    norm_w, norm_b, dew, deb = refs[15:19]
    o_ref = refs[19]

    # patch-embed (conv-as-matmul) with fused {cls row, pos embed, patch bias} additive term
    x = _mm(xk_ref[0], patch_w_ref[...]) + add_ref[0]           # (Lp, D)
    Lp = x.shape[0]

    kidx = jax.lax.broadcasted_iota(jnp.int32, (1, Lp, Lp), 2)
    attn_bias = jnp.where(kidx < n_valid, 0.0, -1e30)

    for layer in range(depth):                                  # static unroll (DEPTH=2)
        wts = tuple(r[layer] for r in blk_refs)
        x = _transformer_block(x, wts, attn_bias, num_heads)

    x = _layernorm(x, norm_w[...], norm_b[...])
    # fused decoder_embed epilogue
    o_ref[0] = _mm(x, dew[...]) + deb[...]


def decoder_stack_kernel(*refs, depth, num_heads, n_valid, inv_patch_dim):
    # refs: xd, pos, 12 stacked block weights, norm_w, norm_b, pred_w, pred_b,
    #       target, loss_mask, pred_out, loss_out
    xd_ref, pos_ref = refs[0], refs[1]
    blk_refs = refs[2:14]
    norm_w, norm_b, predw, predb, tgt_ref, lmask_ref = refs[14:20]
    pred_ref, loss_ref = refs[20], refs[21]

    x = xd_ref[0] + pos_ref[...]                                # fused dec_pos_embed add
    Lp = x.shape[0]

    kidx = jax.lax.broadcasted_iota(jnp.int32, (1, Lp, Lp), 2)
    attn_bias = jnp.where(kidx < n_valid, 0.0, -1e30)

    for layer in range(depth):                                  # static unroll (DEC_DEPTH=2)
        wts = tuple(r[layer] for r in blk_refs)
        x = _transformer_block(x, wts, attn_bias, num_heads)

    x = _layernorm(x, norm_w[...], norm_b[...])
    pred = _mm(x, predw[...]) + predb[...]                      # (Lp, 128) lane-dense
    pred_ref[0] = pred

    # fused masked-MSE loss numerator for this batch element
    d = pred - tgt_ref[0]
    num = jnp.sum(d * d * lmask_ref[0]) * inv_patch_dim
    loss_ref[0] = jnp.zeros((1, PRED_PAD), jnp.float32) + num


# ------------------------------ pallas wrappers ------------------------------
def _batch_spec(shape):
    nd = len(shape)
    return pl.BlockSpec((1,) + tuple(shape[1:]), lambda b: (b,) + (0,) * (nd - 1))


def _full_spec(shape):
    nd = len(shape)
    return pl.BlockSpec(tuple(shape), lambda b: (0,) * nd)


def run_encoder_stack(xk_pad, add_enc, patch_w, enc_stk, norm_w, norm_b, dew, deb, n_valid):
    N, LP, _ = xk_pad.shape
    blk_arrays = [enc_stk[k] for k in BLOCK_KEYS]
    operands = [xk_pad, add_enc, patch_w] + blk_arrays + [norm_w, norm_b, dew, deb]
    in_specs = ([_batch_spec(xk_pad.shape), _batch_spec(add_enc.shape)]
                + [_full_spec(a.shape)
                   for a in [patch_w] + blk_arrays + [norm_w, norm_b, dew, deb]])
    return pl.pallas_call(
        partial(encoder_stack_kernel, depth=DEPTH, num_heads=NUM_HEADS, n_valid=n_valid),
        out_shape=jax.ShapeDtypeStruct((N, LP, DEC_DIM), jnp.float32),
        grid=(N,),
        in_specs=in_specs,
        out_specs=pl.BlockSpec((1, LP, DEC_DIM), lambda b: (b, 0, 0)),
        compiler_params=pltpu.CompilerParams(dimension_semantics=("parallel",)),
    )(*operands)


def run_decoder_stack(xd_pad, dec_pos_pad, dec_stk, norm_w, norm_b,
                      predw_pad, predb_pad, tgt_pad, lmask_pad, n_valid):
    N, LP, _ = xd_pad.shape
    blk_arrays = [dec_stk[k] for k in BLOCK_KEYS]
    operands = ([xd_pad, dec_pos_pad] + blk_arrays
                + [norm_w, norm_b, predw_pad, predb_pad, tgt_pad, lmask_pad])
    in_specs = ([_batch_spec(xd_pad.shape), _full_spec(dec_pos_pad.shape)]
                + [_full_spec(a.shape)
                   for a in blk_arrays + [norm_w, norm_b, predw_pad, predb_pad]]
                + [_batch_spec(tgt_pad.shape), _batch_spec(lmask_pad.shape)])
    return pl.pallas_call(
        partial(decoder_stack_kernel, depth=DEC_DEPTH, num_heads=DEC_NUM_HEADS,
                n_valid=n_valid, inv_patch_dim=1.0 / PATCH_DIM),
        out_shape=(jax.ShapeDtypeStruct((N, LP, PRED_PAD), jnp.float32),
                   jax.ShapeDtypeStruct((N, 1, PRED_PAD), jnp.float32)),
        grid=(N,),
        in_specs=in_specs,
        out_specs=(pl.BlockSpec((1, LP, PRED_PAD), lambda b: (b, 0, 0)),
                   pl.BlockSpec((1, 1, PRED_PAD), lambda b: (b, 0, 0))),
        compiler_params=pltpu.CompilerParams(dimension_semantics=("parallel",)),
    )(*operands)


# --------------------------- parameter construction ---------------------------
def get_1d_sincos(embed_dim, pos):
    omega = np.arange(embed_dim // 2, dtype=np.float64) / (embed_dim / 2.0)
    omega = 1.0 / 10000 ** omega
    pos = pos.reshape(-1)
    out = np.einsum('m,d->md', pos, omega)
    return np.concatenate([np.sin(out), np.cos(out)], axis=1)


def get_2d_sincos_pos_embed(embed_dim, grid_size, cls_token=False):
    gh = np.arange(grid_size, dtype=np.float32)
    gw = np.arange(grid_size, dtype=np.float32)
    grid = np.meshgrid(gw, gh)                 # w first, matching reference code
    grid = np.stack(grid, axis=0).reshape([2, 1, grid_size, grid_size])
    emb_h = get_1d_sincos(embed_dim // 2, grid[0])
    emb_w = get_1d_sincos(embed_dim // 2, grid[1])
    pe = np.concatenate([emb_h, emb_w], axis=1)
    if cls_token:
        pe = np.concatenate([np.zeros([1, embed_dim]), pe], axis=0)
    return pe.astype(np.float32)


def init_params(key):
    keys = iter(jax.random.split(key, 64))

    def nrm(shape, std=0.02):
        return (std * jax.random.normal(next(keys), shape)).astype(jnp.float32)

    def block_params(dim, hidden):
        return dict(
            ln1_w=jnp.ones((1, dim), jnp.float32), ln1_b=jnp.zeros((1, dim), jnp.float32),
            qkv_w=nrm((dim, 3 * dim)), qkv_b=jnp.zeros((1, 3 * dim), jnp.float32),
            proj_w=nrm((dim, dim)), proj_b=jnp.zeros((1, dim), jnp.float32),
            ln2_w=jnp.ones((1, dim), jnp.float32), ln2_b=jnp.zeros((1, dim), jnp.float32),
            fc1_w=nrm((dim, hidden)), fc1_b=jnp.zeros((1, hidden), jnp.float32),
            fc2_w=nrm((hidden, dim)), fc2_b=jnp.zeros((1, dim), jnp.float32),
        )

    hidden = int(EMBED_DIM * MLP_RATIO)
    dec_hidden = int(DEC_DIM * MLP_RATIO)
    params = dict(
        patch_w=nrm((PATCH_DIM, EMBED_DIM)),               # conv as linear (c,p,p order)
        patch_b=jnp.zeros((1, EMBED_DIM), jnp.float32),
        cls_token=nrm((1, 1, EMBED_DIM)),
        mask_token=nrm((1, 1, DEC_DIM)),
        pos_embed=jnp.asarray(get_2d_sincos_pos_embed(EMBED_DIM, GRID_SIZE, True))[None],
        dec_pos_embed=jnp.asarray(get_2d_sincos_pos_embed(DEC_DIM, GRID_SIZE, True))[None],
        enc_blocks=[block_params(EMBED_DIM, hidden) for _ in range(DEPTH)],
        dec_blocks=[block_params(DEC_DIM, dec_hidden) for _ in range(DEC_DEPTH)],
        norm_w=jnp.ones((1, EMBED_DIM), jnp.float32), norm_b=jnp.zeros((1, EMBED_DIM), jnp.float32),
        dec_embed_w=nrm((EMBED_DIM, DEC_DIM)), dec_embed_b=jnp.zeros((1, DEC_DIM), jnp.float32),
        dec_norm_w=jnp.ones((1, DEC_DIM), jnp.float32), dec_norm_b=jnp.zeros((1, DEC_DIM), jnp.float32),
        dec_pred_w=nrm((DEC_DIM, PATCH_DIM)), dec_pred_b=jnp.zeros((1, PATCH_DIM), jnp.float32),
    )
    return params


def pack_block_params(blocks, dim, num_heads):
    """Stack per-layer weights along a leading layer axis; fold 1/sqrt(dh) into q."""
    stk = {k: jnp.stack([blk[k] for blk in blocks], axis=0) for k in BLOCK_KEYS}
    scale = (dim // num_heads) ** -0.5
    stk['qkv_w'] = stk['qkv_w'].at[:, :, :dim].multiply(scale)
    stk['qkv_b'] = stk['qkv_b'].at[:, :, :dim].multiply(scale)
    return stk


# ------------------------------- forward pass -------------------------------
def mae_forward(params, imgs, mask_ratio, rng):
    N, C, H, W = imgs.shape
    p = PATCH
    h = w = H // p
    L = h * w
    D = EMBED_DIM
    Dd = DEC_DIM

    # ---------------- patchify (plain-JAX reshapes) ----------------
    # conv-equivalent (c,p,p) order for patch embedding
    xp = imgs.reshape(N, C, h, p, w, p).transpose(0, 2, 4, 1, 3, 5).reshape(N, L, C * p * p)
    # reference-target 'nchpwq->nhwpqc' (p,p,c) order for the loss
    tgt = imgs.reshape(N, C, h, p, w, p).transpose(0, 2, 4, 3, 5, 1).reshape(N, L, C * p * p)

    # ---------------- random masking (argsort of uniform noise, JAX glue) ----------------
    len_keep = int(L * (1 - mask_ratio))
    noise = jax.random.uniform(rng, (N, L))
    ids_shuffle = jnp.argsort(noise, axis=1)
    ids_restore = jnp.argsort(ids_shuffle, axis=1)
    ids_keep = ids_shuffle[:, :len_keep]
    mask = jnp.ones((N, L), jnp.float32).at[:, :len_keep].set(0.0)
    mask = jnp.take_along_axis(mask, ids_restore, axis=1)

    xp_keep = jnp.take_along_axis(xp, ids_keep[:, :, None], axis=1)          # (N, keep, p^2*C)
    pos_keep = jnp.take_along_axis(
        jnp.broadcast_to(params['pos_embed'][:, 1:, :], (N, L, D)),
        ids_keep[:, :, None], axis=1)                                        # (N, keep, D)

    # ---------------- fused encoder stack ----------------
    n_valid_e = 1 + len_keep
    LP_E = _round_up(n_valid_e, 8)
    xk_pad = jnp.zeros((N, LP_E, C * p * p), jnp.float32).at[:, 1:n_valid_e, :].set(xp_keep)
    cls_row = params['cls_token'][0] + params['pos_embed'][:, 0, :]          # (1, D)
    add_enc = jnp.zeros((N, LP_E, D), jnp.float32)
    add_enc = add_enc.at[:, 0, :].set(jnp.broadcast_to(cls_row, (N, D)))
    add_enc = add_enc.at[:, 1:n_valid_e, :].set(pos_keep + params['patch_b'])

    enc_stk = pack_block_params(params['enc_blocks'], D, NUM_HEADS)
    latent_dec = run_encoder_stack(xk_pad, add_enc, params['patch_w'], enc_stk,
                                   params['norm_w'], params['norm_b'],
                                   params['dec_embed_w'], params['dec_embed_b'],
                                   n_valid_e)
    xd = latent_dec[:, :n_valid_e, :]                                        # (N, 1+keep, Dd)

    # ---------------- decoder token assembly (JAX glue: gather + concat) ----------------
    n_mask_tok = L + 1 - n_valid_e
    mask_tokens = jnp.broadcast_to(params['mask_token'], (N, n_mask_tok, Dd))
    x_ = jnp.concatenate([xd[:, 1:, :], mask_tokens], axis=1)
    x_ = jnp.take_along_axis(x_, ids_restore[:, :, None], axis=1)
    xd_full = jnp.concatenate([xd[:, :1, :], x_], axis=1)                    # (N, L+1, Dd)

    n_valid_d = L + 1
    LP_D = _round_up(n_valid_d, 8)
    xd_pad = jnp.zeros((N, LP_D, Dd), jnp.float32).at[:, :n_valid_d, :].set(xd_full)
    dec_pos_pad = jnp.zeros((LP_D, Dd), jnp.float32).at[:n_valid_d, :].set(params['dec_pos_embed'][0])

    # loss-side inputs (lane-dense padded target / mask) and padded pred head
    tgt_pad = jnp.zeros((N, LP_D, PRED_PAD), jnp.float32).at[:, 1:1 + L, :PATCH_DIM].set(tgt)
    lmask_pad = jnp.zeros((N, LP_D, PRED_PAD), jnp.float32).at[:, 1:1 + L, :].set(
        jnp.broadcast_to(mask[:, :, None], (N, L, PRED_PAD)))
    predw_pad = jnp.zeros((Dd, PRED_PAD), jnp.float32).at[:, :PATCH_DIM].set(params['dec_pred_w'])
    predb_pad = jnp.zeros((1, PRED_PAD), jnp.float32).at[:, :PATCH_DIM].set(params['dec_pred_b'])

    dec_stk = pack_block_params(params['dec_blocks'], Dd, DEC_NUM_HEADS)
    pred_pad, loss_num = run_decoder_stack(xd_pad, dec_pos_pad, dec_stk,
                                           params['dec_norm_w'], params['dec_norm_b'],
                                           predw_pad, predb_pad, tgt_pad, lmask_pad,
                                           n_valid_d)

    pred = pred_pad[:, 1:1 + L, :PATCH_DIM]
    loss = jnp.sum(loss_num[:, 0, 0]) / jnp.sum(mask)
    # TODO(synk): vae / quantile / norm_pix_loss branches are disabled by default and not implemented.
    return loss, pred, mask


# ---------------------------------- main ----------------------------------
if __name__ == "__main__":
    key = jax.random.PRNGKey(0)
    pkey, xkey, mkey = jax.random.split(key, 3)
    params = init_params(pkey)
    imgs = jax.random.normal(xkey, (2, IN_CHANS, IMG_SIZE, IMG_SIZE), jnp.float32)

    loss, pred, mask = mae_forward(params, imgs, MASK_RATIO, mkey)
    jax.block_until_ready((loss, pred, mask))

    assert pred.shape == (2, NUM_PATCHES, PATCH_DIM)
    assert mask.shape == (2, NUM_PATCHES)
    assert loss.shape == ()
    assert bool(jnp.isfinite(loss))
    print("KERNEL_OK")
</pallas_src>

<mosaic_0001>
module attributes {stable_mosaic.version = 11 : i64} {
  func.func @encoder_stack_kernel(%arg0: i32, %arg1: memref<1x8x48xf32, #tpu.memory_space<vmem>>, %arg2: memref<1x8x32xf32, #tpu.memory_space<vmem>>, %arg3: memref<48x32xf32, #tpu.memory_space<vmem>>, %arg4: memref<2x1x32xf32, #tpu.memory_space<vmem>>, %arg5: memref<2x1x32xf32, #tpu.memory_space<vmem>>, %arg6: memref<2x32x96xf32, #tpu.memory_space<vmem>>, %arg7: memref<2x1x96xf32, #tpu.memory_space<vmem>>, %arg8: memref<2x32x32xf32, #tpu.memory_space<vmem>>, %arg9: memref<2x1x32xf32, #tpu.memory_space<vmem>>, %arg10: memref<2x1x32xf32, #tpu.memory_space<vmem>>, %arg11: memref<2x1x32xf32, #tpu.memory_space<vmem>>, %arg12: memref<2x32x128xf32, #tpu.memory_space<vmem>>, %arg13: memref<2x1x128xf32, #tpu.memory_space<vmem>>, %arg14: memref<2x128x32xf32, #tpu.memory_space<vmem>>, %arg15: memref<2x1x32xf32, #tpu.memory_space<vmem>>, %arg16: memref<1x32xf32, #tpu.memory_space<vmem>>, %arg17: memref<1x32xf32, #tpu.memory_space<vmem>>, %arg18: memref<32x32xf32, #tpu.memory_space<vmem>>, %arg19: memref<1x32xf32, #tpu.memory_space<vmem>>, %arg20: memref<1x8x32xf32, #tpu.memory_space<vmem>>) attributes {dimension_semantics = [#tpu.dimension_semantics<parallel>], iteration_bounds = array<i64: 2>, scalar_prefetch = 0 : i64, scratch_operands = 0 : i64, tpu.core_type = #tpu.core_type<tc>, window_params = [{transform_indices = @transform_0, window_bounds = array<i64: 1, 8, 48>}, {transform_indices = @transform_1, window_bounds = array<i64: 1, 8, 32>}, {pipeline_mode = #tpu.pipeline_mode<synchronous>, transform_indices = @transform_2, window_bounds = array<i64: 48, 32>}, {pipeline_mode = #tpu.pipeline_mode<synchronous>, transform_indices = @transform_3, window_bounds = array<i64: 2, 1, 32>}, {pipeline_mode = #tpu.pipeline_mode<synchronous>, transform_indices = @transform_4, window_bounds = array<i64: 2, 1, 32>}, {pipeline_mode = #tpu.pipeline_mode<synchronous>, transform_indices = @transform_5, window_bounds = array<i64: 2, 32, 96>}, {pipeline_mode = #tpu.pipeline_mode<synchronous>, transform_indices = @transform_6, window_bounds = array<i64: 2, 1, 96>}, {pipeline_mode = #tpu.pipeline_mode<synchronous>, transform_indices = @transform_7, window_bounds = array<i64: 2, 32, 32>}, {pipeline_mode = #tpu.pipeline_mode<synchronous>, transform_indices = @transform_8, window_bounds = array<i64: 2, 1, 32>}, {pipeline_mode = #tpu.pipeline_mode<synchronous>, transform_indices = @transform_9, window_bounds = array<i64: 2, 1, 32>}, {pipeline_mode = #tpu.pipeline_mode<synchronous>, transform_indices = @transform_10, window_bounds = array<i64: 2, 1, 32>}, {pipeline_mode = #tpu.pipeline_mode<synchronous>, transform_indices = @transform_11, window_bounds = array<i64: 2, 32, 128>}, {pipeline_mode = #tpu.pipeline_mode<synchronous>, transform_indices = @transform_12, window_bounds = array<i64: 2, 1, 128>}, {pipeline_mode = #tpu.pipeline_mode<synchronous>, transform_indices = @transform_13, window_bounds = array<i64: 2, 128, 32>}, {pipeline_mode = #tpu.pipeline_mode<synchronous>, transform_indices = @transform_14, window_bounds = array<i64: 2, 1, 32>}, {pipeline_mode = #tpu.pipeline_mode<synchronous>, transform_indices = @transform_15, window_bounds = array<i64: 1, 32>}, {pipeline_mode = #tpu.pipeline_mode<synchronous>, transform_indices = @transform_16, window_bounds = array<i64: 1, 32>}, {pipeline_mode = #tpu.pipeline_mode<synchronous>, transform_indices = @transform_17, window_bounds = array<i64: 32, 32>}, {pipeline_mode = #tpu.pipeline_mode<synchronous>, transform_indices = @transform_18, window_bounds = array<i64: 1, 32>}, {transform_indices = @transform_19, window_bounds = array<i64: 1, 8, 32>}]} {
    %c0 = arith.constant 0 : index
    %c0_0 = arith.constant 0 : index
    %c0_1 = arith.constant 0 : index
    %0 = vector.load %arg1[%c0, %c0_0, %c0_1] : memref<1x8x48xf32, #tpu.memory_space<vmem>>, vector<1x8x48xf32>
    %1 = vector.shape_cast %0 : vector<1x8x48xf32> to vector<8x48xf32>
    %c0_2 = arith.constant 0 : index
    %c0_3 = arith.constant 0 : index
    %2 = vector.load %arg3[%c0_2, %c0_3] : memref<48x32xf32, #tpu.memory_space<vmem>>, vector<48x32xf32>
    %cst = arith.constant dense<0.000000e+00> : vector<8x32xf32>
    %3 = tpu.matmul %1, %2, %cst {dimension_numbers = #tpu.dot_dimension_numbers<[1], [0], [0], [1], [0, 0, 1, 1], [], []>} : vector<8x48xf32>, vector<48x32xf32>, vector<8x32xf32> -> vector<8x32xf32>
    %c0_4 = arith.constant 0 : index
    %c0_5 = arith.constant 0 : index
    %c0_6 = arith.constant 0 : index
    %4 = vector.load %arg2[%c0_4, %c0_5, %c0_6] : memref<1x8x32xf32, #tpu.memory_space<vmem>>, vector<1x8x32xf32>
    %5 = vector.shape_cast %4 : vector<1x8x32xf32> to vector<8x32xf32>
    %6 = arith.addf %3, %5 : vector<8x32xf32>
    %7 = tpu.iota {dimensions = array<i32: 2>} : vector<1x8x8xi32>
    %c5_i32 = arith.constant 5 : i32
    %8 = vector.broadcast %c5_i32 : i32 to vector<1x8x8xi32>
    %9 = arith.cmpi slt, %7, %8 : vector<1x8x8xi32>
    %cst_7 = arith.constant 0.000000e+00 : f32
    %cst_8 = arith.constant -1.000000e+30 : f32
    %10 = vector.broadcast %cst_7 : f32 to vector<1x8x8xf32>
    %11 = vector.broadcast %cst_8 : f32 to vector<1x8x8xf32>
    %12 = arith.select %9, %10, %11 : vector<1x8x8xi1>, vector<1x8x8xf32>
    %c0_9 = arith.constant 0 : index
    %c0_10 = arith.constant 0 : index
    %c0_11 = arith.constant 0 : index
    %13 = vector.load %arg4[%c0_9, %c0_10, %c0_11] : memref<2x1x32xf32, #tpu.memory_space<vmem>>, vector<1x1x32xf32>
    %14 = vector.shape_cast %13 : vector<1x1x32xf32> to vector<1x32xf32>
    %c0_12 = arith.constant 0 : index
    %c0_13 = arith.constant 0 : index
    %c0_14 = arith.constant 0 : index
    %15 = vector.load %arg5[%c0_12, %c0_13, %c0_14] : memref<2x1x32xf32, #tpu.memory_space<vmem>>, vector<1x1x32xf32>
    %16 = vector.shape_cast %15 : vector<1x1x32xf32> to vector<1x32xf32>
    %c0_15 = arith.constant 0 : index
    %c0_16 = arith.constant 0 : index
    %c0_17 = arith.constant 0 : index
    %17 = vector.load %arg6[%c0_15, %c0_16, %c0_17] : memref<2x32x96xf32, #tpu.memory_space<vmem>>, vector<1x32x96xf32>
    %18 = vector.shape_cast %17 : vector<1x32x96xf32> to vector<32x96xf32>
    %c0_18 = arith.constant 0 : index
    %c0_19 = arith.constant 0 : index
    %c0_20 = arith.constant 0 : index
    %19 = vector.load %arg7[%c0_18, %c0_19, %c0_20] : memref<2x1x96xf32, #tpu.memory_space<vmem>>, vector<1x1x96xf32>
    %20 = vector.shape_cast %19 : vector<1x1x96xf32> to vector<1x96xf32>
    %c0_21 = arith.constant 0 : index
    %c0_22 = arith.constant 0 : index
    %c0_23 = arith.constant 0 : index
    %21 = vector.load %arg8[%c0_21, %c0_22, %c0_23] : memref<2x32x32xf32, #tpu.memory_space<vmem>>, vector<1x32x32xf32>
    %22 = vector.shape_cast %21 : vector<1x32x32xf32> to vector<32x32xf32>
    %c0_24 = arith.constant 0 : index
    %c0_25 = arith.constant 0 : index
    %c0_26 = arith.constant 0 : index
    %23 = vector.load %arg9[%c0_24, %c0_25, %c0_26] : memref<2x1x32xf32, #tpu.memory_space<vmem>>, vector<1x1x32xf32>
    %24 = vector.shape_cast %23 : vector<1x1x32xf32> to vector<1x32xf32>
    %c0_27 = arith.constant 0 : index
    %c0_28 = arith.constant 0 : index
    %c0_29 = arith.constant 0 : index
    %25 = vector.load %arg10[%c0_27, %c0_28, %c0_29] : memref<2x1x32xf32, #tpu.memory_space<vmem>>, vector<1x1x32xf32>
    %26 = vector.shape_cast %25 : vector<1x1x32xf32> to vector<1x32xf32>
    %c0_30 = arith.constant 0 : index
    %c0_31 = arith.constant 0 : index
    %c0_32 = arith.constant 0 : index
    %27 = vector.load %arg11[%c0_30, %c0_31, %c0_32] : memref<2x1x32xf32, #tpu.memory_space<vmem>>, vector<1x1x32xf32>
    %28 = vector.shape_cast %27 : vector<1x1x32xf32> to vector<1x32xf32>
    %c0_33 = arith.constant 0 : index
    %c0_34 = arith.constant 0 : index
    %c0_35 = arith.constant 0 : index
    %29 = vector.load %arg12[%c0_33, %c0_34, %c0_35] : memref<2x32x128xf32, #tpu.memory_space<vmem>>, vector<1x32x128xf32>
    %30 = vector.shape_cast %29 : vector<1x32x128xf32> to vector<32x128xf32>
    %c0_36 = arith.constant 0 : index
    %c0_37 = arith.constant 0 : index
    %c0_38 = arith.constant 0 : index
    %31 = vector.load %arg13[%c0_36, %c0_37, %c0_38] : memref<2x1x128xf32, #tpu.memory_space<vmem>>, vector<1x1x128xf32>
    %32 = vector.shape_cast %31 : vector<1x1x128xf32> to vector<1x128xf32>
    %c0_39 = arith.constant 0 : index
    %c0_40 = arith.constant 0 : index
    %c0_41 = arith.constant 0 : index
    %33 = vector.load %arg14[%c0_39, %c0_40, %c0_41] : memref<2x128x32xf32, #tpu.memory_space<vmem>>, vector<1x128x32xf32>
    %34 = vector.shape_cast %33 : vector<1x128x32xf32> to vector<128x32xf32>
    %c0_42 = arith.constant 0 : index
    %c0_43 = arith.constant 0 : index
    %c0_44 = arith.constant 0 : index
    %35 = vector.load %arg15[%c0_42, %c0_43, %c0_44] : memref<2x1x32xf32, #tpu.memory_space<vmem>>, vector<1x1x32xf32>
    %36 = vector.shape_cast %35 : vector<1x1x32xf32> to vector<1x32xf32>
    %cst_45 = arith.constant dense<0.000000e+00> : vector<8xf32>
    %37 = vector.multi_reduction <add>, %6, %cst_45 [1] : vector<8x32xf32> to vector<8xf32>
    %38 = vector.shape_cast %37 : vector<8xf32> to vector<8x1xf32>
    %cst_46 = arith.constant 3.200000e+01 : f32
    %39 = vector.broadcast %cst_46 : f32 to vector<8x1xf32>
    %40 = arith.divf %38, %39 : vector<8x1xf32>
    %41 = vector.broadcast %40 : vector<8x1xf32> to vector<8x32xf32>
    %42 = arith.subf %6, %41 : vector<8x32xf32>
    %43 = arith.mulf %42, %42 : vector<8x32xf32>
    %cst_47 = arith.constant dense<0.000000e+00> : vector<8xf32>
    %44 = vector.multi_reduction <add>, %43, %cst_47 [1] : vector<8x32xf32> to vector<8xf32>
    %45 = vector.shape_cast %44 : vector<8xf32> to vector<8x1xf32>
    %cst_48 = arith.constant 3.200000e+01 : f32
    %46 = vector.broadcast %cst_48 : f32 to vector<8x1xf32>
    %47 = arith.divf %45, %46 : vector<8x1xf32>
    %48 = vector.broadcast %40 : vector<8x1xf32> to vector<8x32xf32>
    %49 = arith.subf %6, %48 : vector<8x32xf32>
    %cst_49 = arith.constant 9.99999974E-6 : f32
    %50 = vector.broadcast %cst_49 : f32 to vector<8x1xf32>
    %51 = arith.addf %47, %50 : vector<8x1xf32>
    %52 = math.sqrt %51 : vector<8x1xf32>
    %53 = vector.broadcast %52 : vector<8x1xf32> to vector<8x32xf32>
    %54 = arith.divf %49, %53 : vector<8x32xf32>
    %55 = vector.broadcast %14 : vector<1x32xf32> to vector<8x32xf32>
    %56 = arith.mulf %54, %55 : vector<8x32xf32>
    %57 = vector.broadcast %16 : vector<1x32xf32> to vector<8x32xf32>
    %58 = arith.addf %56, %57 : vector<8x32xf32>
    %cst_50 = arith.constant dense<0.000000e+00> : vector<8x96xf32>
    %59 = tpu.matmul %58, %18, %cst_50 {dimension_numbers = #tpu.dot_dimension_numbers<[1], [0], [0], [1], [0, 0, 1, 1], [], []>} : vector<8x32xf32>, vector<32x96xf32>, vector<8x96xf32> -> vector<8x96xf32>
    %60 = vector.broadcast %20 : vector<1x96xf32> to vector<8x96xf32>
    %61 = arith.addf %59, %60 : vector<8x96xf32>
    %62 = vector.extract_strided_slice %61 {offsets = [0, 0], sizes = [8, 32], strides = [1, 1]} : vector<8x96xf32> to vector<8x32xf32>
    %63 = vector.shape_cast %62 : vector<8x32xf32> to vector<8x4x8xf32>
    %64 = vector.extract_strided_slice %61 {offsets = [0, 32], sizes = [8, 32], strides = [1, 1]} : vector<8x96xf32> to vector<8x32xf32>
    %65 = vector.shape_cast %64 : vector<8x32xf32> to vector<8x4x8xf32>
    %66 = vector.extract_strided_slice %61 {offsets = [0, 64], sizes = [8, 32], strides = [1, 1]} : vector<8x96xf32> to vector<8x32xf32>
    %67 = vector.shape_cast %66 : vector<8x32xf32> to vector<8x4x8xf32>
    "tpu.trace_start"() <{level = 10 : i32, message = "qhd,khd->hqk"}> : () -> ()
    %cst_51 = arith.constant dense<0.000000e+00> : vector<4x8x8xf32>
    %68 = tpu.matmul %63, %65, %cst_51 {dimension_numbers = #tpu.dot_dimension_numbers<[2], [2], [0], [0], [0, 1, 0, 0, 1, 0], [1], [1]>} : vector<8x4x8xf32>, vector<8x4x8xf32>, vector<4x8x8xf32> -> vector<4x8x8xf32>
    "tpu.trace_stop"() : () -> ()
    %69 = vector.broadcast %12 : vector<1x8x8xf32> to vector<4x8x8xf32>
    %70 = arith.addf %68, %69 : vector<4x8x8xf32>
    %cst_52 = arith.constant dense<0xFF800000> : vector<4x8xf32>
    %71 = vector.multi_reduction <maximumf>, %70, %cst_52 [2] : vector<4x8x8xf32> to vector<4x8xf32>
    %72 = vector.shape_cast %71 : vector<4x8xf32> to vector<4x8x1xf32>
    %73 = vector.broadcast %72 : vector<4x8x1xf32> to vector<4x8x8xf32>
    %74 = arith.subf %70, %73 : vector<4x8x8xf32>
    %75 = math.exp %74 : vector<4x8x8xf32>
    %cst_53 = arith.constant dense<0.000000e+00> : vector<4x8xf32>
    %76 = vector.multi_reduction <add>, %75, %cst_53 [2] : vector<4x8x8xf32> to vector<4x8xf32>
    %77 = vector.shape_cast %76 : vector<4x8xf32> to vector<4x8x1xf32>
    %78 = vector.broadcast %77 : vector<4x8x1xf32> to vector<4x8x8xf32>
    %79 = arith.divf %75, %78 : vector<4x8x8xf32>
    "tpu.trace_start"() <{level = 10 : i32, message = "hqk,khd->qhd"}> : () -> ()
    %cst_54 = arith.constant dense<0.000000e+00> : vector<4x8x8xf32>
    %80 = tpu.matmul %67, %79, %cst_54 {dimension_numbers = #tpu.dot_dimension_numbers<[0], [2], [2], [1], [0, 1, 0, 2, 1, 1], [1], [0]>} : vector<8x4x8xf32>, vector<4x8x8xf32>, vector<4x8x8xf32> -> vector<4x8x8xf32>
    %81 = tpu.transpose %80, [2, 0, 1] : vector<4x8x8xf32> -> vector<8x4x8xf32>
    "tpu.trace_stop"() : () -> ()
    %82 = vector.shape_cast %81 : vector<8x4x8xf32> to vector<8x32xf32>
    %cst_55 = arith.constant dense<0.000000e+00> : vector<8x32xf32>
    %83 = tpu.matmul %82, %22, %cst_55 {dimension_numbers = #tpu.dot_dimension_numbers<[1], [0], [0], [1], [0, 0, 1, 1], [], []>} : vector<8x32xf32>, vector<32x32xf32>, vector<8x32xf32> -> vector<8x32xf32>
    %84 = vector.broadcast %24 : vector<1x32xf32> to vector<8x32xf32>
    %85 = arith.addf %83, %84 : vector<8x32xf32>
    %86 = arith.addf %6, %85 : vector<8x32xf32>
    %cst_56 = arith.constant dense<0.000000e+00> : vector<8xf32>
    %87 = vector.multi_reduction <add>, %86, %cst_56 [1] : vector<8x32xf32> to vector<8xf32>
    %88 = vector.shape_cast %87 : vector<8xf32> to vector<8x1xf32>
    %cst_57 = arith.constant 3.200000e+01 : f32
    %89 = vector.broadcast %cst_57 : f32 to vector<8x1xf32>
    %90 = arith.divf %88, %89 : vector<8x1xf32>
    %91 = vector.broadcast %90 : vector<8x1xf32> to vector<8x32xf32>
    %92 = arith.subf %86, %91 : vector<8x32xf32>
    %93 = arith.mulf %92, %92 : vector<8x32xf32>
    %cst_58 = arith.constant dense<0.000000e+00> : vector<8xf32>
    %94 = vector.multi_reduction <add>, %93, %cst_58 [1] : vector<8x32xf32> to vector<8xf32>
    %95 = vector.shape_cast %94 : vector<8xf32> to vector<8x1xf32>
    %cst_59 = arith.constant 3.200000e+01 : f32
    %96 = vector.broadcast %cst_59 : f32 to vector<8x1xf32>
    %97 = arith.divf %95, %96 : vector<8x1xf32>
    %98 = vector.broadcast %90 : vector<8x1xf32> to vector<8x32xf32>
    %99 = arith.subf %86, %98 : vector<8x32xf32>
    %cst_60 = arith.constant 9.99999974E-6 : f32
    %100 = vector.broadcast %cst_60 : f32 to vector<8x1xf32>
    %101 = arith.addf %97, %100 : vector<8x1xf32>
    %102 = math.sqrt %101 : vector<8x1xf32>
    %103 = vector.broadcast %102 : vector<8x1xf32> to vector<8x32xf32>
    %104 = arith.divf %99, %103 : vector<8x32xf32>
    %105 = vector.broadcast %26 : vector<1x32xf32> to vector<8x32xf32>
    %106 = arith.mulf %104, %105 : vector<8x32xf32>
    %107 = vector.broadcast %28 : vector<1x32xf32> to vector<8x32xf32>
    %108 = arith.addf %106, %107 : vector<8x32xf32>
    %cst_61 = arith.constant dense<0.000000e+00> : vector<8x128xf32>
    %109 = tpu.matmul %108, %30, %cst_61 {dimension_numbers = #tpu.dot_dimension_numbers<[1], [0], [0], [1], [0, 0, 1, 1], [], []>} : vector<8x32xf32>, vector<32x128xf32>, vector<8x128xf32> -> vector<8x128xf32>
    %110 = vector.broadcast %32 : vector<1x128xf32> to vector<8x128xf32>
    %111 = arith.addf %109, %110 : vector<8x128xf32>
    %cst_62 = arith.constant 5.000000e-01 : f32
    %112 = vector.broadcast %cst_62 : f32 to vector<8x128xf32>
    %113 = arith.mulf %112, %111 : vector<8x128xf32>
    %cst_63 = arith.constant 0.707106769 : f32
    %114 = vector.broadcast %cst_63 : f32 to vector<8x128xf32>
    %115 = arith.mulf %111, %114 : vector<8x128xf32>
    %cst_64 = arith.constant 0.000000e+00 : f32
    %116 = vector.broadcast %cst_64 : f32 to vector<8x128xf32>
    %117 = arith.cmpf oge, %115, %116 : vector<8x128xf32>
    %cst_65 = arith.constant 1.000000e+00 : f32
    %cst_66 = arith.constant -1.000000e+00 : f32
    %118 = vector.broadcast %cst_65 : f32 to vector<8x128xf32>
    %119 = vector.broadcast %cst_66 : f32 to vector<8x128xf32>
    %120 = arith.select %117, %118, %119 : vector<8x128xi1>, vector<8x128xf32>
    %121 = math.absf %115 : vector<8x128xf32>
    %cst_67 = arith.constant 0.327591091 : f32
    %122 = vector.broadcast %cst_67 : f32 to vector<8x128xf32>
    %123 = arith.mulf %122, %121 : vector<8x128xf32>
    %cst_68 = arith.constant 1.000000e+00 : f32
    %124 = vector.broadcast %cst_68 : f32 to vector<8x128xf32>
    %125 = arith.addf %124, %123 : vector<8x128xf32>
    %cst_69 = arith.constant 1.000000e+00 : f32
    %126 = vector.broadcast %cst_69 : f32 to vector<8x128xf32>
    %127 = arith.divf %126, %125 : vector<8x128xf32>
    %cst_70 = arith.constant 1.06140542 : f32
    %128 = vector.broadcast %cst_70 : f32 to vector<8x128xf32>
    %129 = arith.mulf %128, %127 : vector<8x128xf32>
    %cst_71 = arith.constant -1.45315206 : f32
    %130 = vector.broadcast %cst_71 : f32 to vector<8x128xf32>
    %131 = arith.addf %129, %130 : vector<8x128xf32>
    %132 = arith.mulf %131, %127 : vector<8x128xf32>
    %cst_72 = arith.constant 1.42141378 : f32
    %133 = vector.broadcast %cst_72 : f32 to vector<8x128xf32>
    %134 = arith.addf %132, %133 : vector<8x128xf32>
    %135 = arith.mulf %134, %127 : vector<8x128xf32>
    %cst_73 = arith.constant -0.284496725 : f32
    %136 = vector.broadcast %cst_73 : f32 to vector<8x128xf32>
    %137 = arith.addf %135, %136 : vector<8x128xf32>
    %138 = arith.mulf %137, %127 : vector<8x128xf32>
    %cst_74 = arith.constant 0.254829586 : f32
    %139 = vector.broadcast %cst_74 : f32 to vector<8x128xf32>
    %140 = arith.addf %138, %139 : vector<8x128xf32>
    %141 = arith.mulf %140, %127 : vector<8x128xf32>
    %cst_75 = arith.constant 0.000000e+00 : f32
    %142 = vector.broadcast %cst_75 : f32 to vector<8x128xf32>
    %143 = arith.subf %142, %121 : vector<8x128xf32>
    %144 = arith.mulf %143, %121 : vector<8x128xf32>
    %145 = math.exp %144 : vector<8x128xf32>
    %146 = arith.mulf %141, %145 : vector<8x128xf32>
    %cst_76 = arith.constant 1.000000e+00 : f32
    %147 = vector.broadcast %cst_76 : f32 to vector<8x128xf32>
    %148 = arith.subf %147, %146 : vector<8x128xf32>
    %149 = arith.mulf %120, %148 : vector<8x128xf32>
    %cst_77 = arith.constant 1.000000e+00 : f32
    %150 = vector.broadcast %cst_77 : f32 to vector<8x128xf32>
    %151 = arith.addf %150, %149 : vector<8x128xf32>
    %152 = arith.mulf %113, %151 : vector<8x128xf32>
    %cst_78 = arith.constant dense<0.000000e+00> : vector<8x32xf32>
    %153 = tpu.matmul %152, %34, %cst_78 {dimension_numbers = #tpu.dot_dimension_numbers<[1], [0], [0], [1], [0, 0, 1, 1], [], []>} : vector<8x128xf32>, vector<128x32xf32>, vector<8x32xf32> -> vector<8x32xf32>
    %154 = vector.broadcast %36 : vector<1x32xf32> to vector<8x32xf32>
    %155 = arith.addf %153, %154 : vector<8x32xf32>
    %156 = arith.addf %86, %155 : vector<8x32xf32>
    %c1 = arith.constant 1 : index
    %c0_79 = arith.constant 0 : index
    %c0_80 = arith.constant 0 : index
    %157 = vector.load %arg4[%c1, %c0_79, %c0_80] : memref<2x1x32xf32, #tpu.memory_space<vmem>>, vector<1x1x32xf32>
    %158 = vector.shape_cast %157 : vector<1x1x32xf32> to vector<1x32xf32>
    %c1_81 = arith.constant 1 : index
    %c0_82 = arith.constant 0 : index
    %c0_83 = arith.constant 0 : index
    %159 = vector.load %arg5[%c1_81, %c0_82, %c0_83] : memref<2x1x32xf32, #tpu.memory_space<vmem>>, vector<1x1x32xf32>
    %160 = vector.shape_cast %159 : vector<1x1x32xf32> to vector<1x32xf32>
    %c1_84 = arith.constant 1 : index
    %c0_85 = arith.constant 0 : index
    %c0_86 = arith.constant 0 : index
    %161 = vector.load %arg6[%c1_84, %c0_85, %c0_86] : memref<2x32x96xf32, #tpu.memory_space<vmem>>, vector<1x32x96xf32>
    %162 = vector.shape_cast %161 : vector<1x32x96xf32> to vector<32x96xf32>
    %c1_87 = arith.constant 1 : index
    %c0_88 = arith.constant 0 : index
    %c0_89 = arith.constant 0 : index
    %163 = vector.load %arg7[%c1_87, %c0_88, %c0_89] : memref<2x1x96xf32, #tpu.memory_space<vmem>>, vector<1x1x96xf32>
    %164 = vector.shape_cast %163 : vector<1x1x96xf32> to vector<1x96xf32>
    %c1_90 = arith.constant 1 : index
    %c0_91 = arith.constant 0 : index
    %c0_92 = arith.constant 0 : index
    %165 = vector.load %arg8[%c1_90, %c0_91, %c0_92] : memref<2x32x32xf32, #tpu.memory_space<vmem>>, vector<1x32x32xf32>
    %166 = vector.shape_cast %165 : vector<1x32x32xf32> to vector<32x32xf32>
    %c1_93 = arith.constant 1 : index
    %c0_94 = arith.constant 0 : index
    %c0_95 = arith.constant 0 : index
    %167 = vector.load %arg9[%c1_93, %c0_94, %c0_95] : memref<2x1x32xf32, #tpu.memory_space<vmem>>, vector<1x1x32xf32>
    %168 = vector.shape_cast %167 : vector<1x1x32xf32> to vector<1x32xf32>
    %c1_96 = arith.constant 1 : index
    %c0_97 = arith.constant 0 : index
    %c0_98 = arith.constant 0 : index
    %169 = vector.load %arg10[%c1_96, %c0_97, %c0_98] : memref<2x1x32xf32, #tpu.memory_space<vmem>>, vector<1x1x32xf32>
    %170 = vector.shape_cast %169 : vector<1x1x32xf32> to vector<1x32xf32>
    %c1_99 = arith.constant 1 : index
    %c0_100 = arith.constant 0 : index
    %c0_101 = arith.constant 0 : index
    %171 = vector.load %arg11[%c1_99, %c0_100, %c0_101] : memref<2x1x32xf32, #tpu.memory_space<vmem>>, vector<1x1x32xf32>
    %172 = vector.shape_cast %171 : vector<1x1x32xf32> to vector<1x32xf32>
    %c1_102 = arith.constant 1 : index
    %c0_103 = arith.constant 0 : index
    %c0_104 = arith.constant 0 : index
    %173 = vector.load %arg12[%c1_102, %c0_103, %c0_104] : memref<2x32x128xf32, #tpu.memory_space<vmem>>, vector<1x32x128xf32>
    %174 = vector.shape_cast %173 : vector<1x32x128xf32> to vector<32x128xf32>
    %c1_105 = arith.constant 1 : index
    %c0_106 = arith.constant 0 : index
    %c0_107 = arith.constant 0 : index
    %175 = vector.load %arg13[%c1_105, %c0_106, %c0_107] : memref<2x1x128xf32, #tpu.memory_space<vmem>>, vector<1x1x128xf32>
    %176 = vector.shape_cast %175 : vector<1x1x128xf32> to vector<1x128xf32>
    %c1_108 = arith.constant 1 : index
    %c0_109 = arith.constant 0 : index
    %c0_110 = arith.constant 0 : index
    %177 = vector.load %arg14[%c1_108, %c0_109, %c0_110] : memref<2x128x32xf32, #tpu.memory_space<vmem>>, vector<1x128x32xf32>
    %178 = vector.shape_cast %177 : vector<1x128x32xf32> to vector<128x32xf32>
    %c1_111 = arith.constant 1 : index
    %c0_112 = arith.constant 0 : index
    %c0_113 = arith.constant 0 : index
    %179 = vector.load %arg15[%c1_111, %c0_112, %c0_113] : memref<2x1x32xf32, #tpu.memory_space<vmem>>, vector<1x1x32xf32>
    %180 = vector.shape_cast %179 : vector<1x1x32xf32> to vector<1x32xf32>
    %cst_114 = arith.constant dense<0.000000e+00> : vector<8xf32>
    %181 = vector.multi_reduction <add>, %156, %cst_114 [1] : vector<8x32xf32> to vector<8xf32>
    %182 = vector.shape_cast %181 : vector<8xf32> to vector<8x1xf32>
    %cst_115 = arith.constant 3.200000e+01 : f32
    %183 = vector.broadcast %cst_115 : f32 to vector<8x1xf32>
    %184 = arith.divf %182, %183 : vector<8x1xf32>
    %185 = vector.broadcast %184 : vector<8x1xf32> to vector<8x32xf32>
    %186 = arith.subf %156, %185 : vector<8x32xf32>
    %187 = arith.mulf %186, %186 : vector<8x32xf32>
    %cst_116 = arith.constant dense<0.000000e+00> : vector<8xf32>
    %188 = vector.multi_reduction <add>, %187, %cst_116 [1] : vector<8x32xf32> to vector<8xf32>
    %189 = vector.shape_cast %188 : vector<8xf32> to vector<8x1xf32>
    %cst_117 = arith.constant 3.200000e+01 : f32
    %190 = vector.broadcast %cst_117 : f32 to vector<8x1xf32>
    %191 = arith.divf %189, %190 : vector<8x1xf32>
    %192 = vector.broadcast %184 : vector<8x1xf32> to vector<8x32xf32>
    %193 = arith.subf %156, %192 : vector<8x32xf32>
    %cst_118 = arith.constant 9.99999974E-6 : f32
    %194 = vector.broadcast %cst_118 : f32 to vector<8x1xf32>
    %195 = arith.addf %191, %194 : vector<8x1xf32>
    %196 = math.sqrt %195 : vector<8x1xf32>
    %197 = vector.broadcast %196 : vector<8x1xf32> to vector<8x32xf32>
    %198 = arith.divf %193, %197 : vector<8x32xf32>
    %199 = vector.broadcast %158 : vector<1x32xf32> to vector<8x32xf32>
    %200 = arith.mulf %198, %199 : vector<8x32xf32>
    %201 = vector.broadcast %160 : vector<1x32xf32> to vector<8x32xf32>
    %202 = arith.addf %200, %201 : vector<8x32xf32>
    %cst_119 = arith.constant dense<0.000000e+00> : vector<8x96xf32>
    %203 = tpu.matmul %202, %162, %cst_119 {dimension_numbers = #tpu.dot_dimension_numbers<[1], [0], [0], [1], [0, 0, 1, 1], [], []>} : vector<8x32xf32>, vector<32x96xf32>, vector<8x96xf32> -> vector<8x96xf32>
    %204 = vector.broadcast %164 : vector<1x96xf32> to vector<8x96xf32>
    %205 = arith.addf %203, %204 : vector<8x96xf32>
    %206 = vector.extract_strided_slice %205 {offsets = [0, 0], sizes = [8, 32], strides = [1, 1]} : vector<8x96xf32> to vector<8x32xf32>
    %207 = vector.shape_cast %206 : vector<8x32xf32> to vector<8x4x8xf32>
    %208 = vector.extract_strided_slice %205 {offsets = [0, 32], sizes = [8, 32], strides = [1, 1]} : vector<8x96xf32> to vector<8x32xf32>
    %209 = vector.shape_cast %208 : vector<8x32xf32> to vector<8x4x8xf32>
    %210 = vector.extract_strided_slice %205 {offsets = [0, 64], sizes = [8, 32], strides = [1, 1]} : vector<8x96xf32> to vector<8x32xf32>
    %211 = vector.shape_cast %210 : vector<8x32xf32> to vector<8x4x8xf32>
    "tpu.trace_start"() <{level = 10 : i32, message = "qhd,khd->hqk"}> : () -> ()
    %cst_120 = arith.constant dense<0.000000e+00> : vector<4x8x8xf32>
    %212 = tpu.matmul %207, %209, %cst_120 {dimension_numbers = #tpu.dot_dimension_numbers<[2], [2], [0], [0], [0, 1, 0, 0, 1, 0], [1], [1]>} : vector<8x4x8xf32>, vector<8x4x8xf32>, vector<4x8x8xf32> -> vector<4x8x8xf32>
    "tpu.trace_stop"() : () -> ()
    %213 = vector.broadcast %12 : vector<1x8x8xf32> to vector<4x8x8xf32>
    %214 = arith.addf %212, %213 : vector<4x8x8xf32>
    %cst_121 = arith.constant dense<0xFF800000> : vector<4x8xf32>
    %215 = vector.multi_reduction <maximumf>, %214, %cst_121 [2] : vector<4x8x8xf32> to vector<4x8xf32>
    %216 = vector.shape_cast %215 : vector<4x8xf32> to vector<4x8x1xf32>
    %217 = vector.broadcast %216 : vector<4x8x1xf32> to vector<4x8x8xf32>
    %218 = arith.subf %214, %217 : vector<4x8x8xf32>
    %219 = math.exp %218 : vector<4x8x8xf32>
    %cst_122 = arith.constant dense<0.000000e+00> : vector<4x8xf32>
    %220 = vector.multi_reduction <add>, %219, %cst_122 [2] : vector<4x8x8xf32> to vector<4x8xf32>
    %221 = vector.shape_cast %220 : vector<4x8xf32> to vector<4x8x1xf32>
    %222 = vector.broadcast %221 : vector<4x8x1xf32> to vector<4x8x8xf32>
    %223 = arith.divf %219, %222 : vector<4x8x8xf32>
    "tpu.trace_start"() <{level = 10 : i32, message = "hqk,khd->qhd"}> : () -> ()
    %cst_123 = arith.constant dense<0.000000e+00> : vector<4x8x8xf32>
    %224 = tpu.matmul %211, %223, %cst_123 {dimension_numbers = #tpu.dot_dimension_numbers<[0], [2], [2], [1], [0, 1, 0, 2, 1, 1], [1], [0]>} : vector<8x4x8xf32>, vector<4x8x8xf32>, vector<4x8x8xf32> -> vector<4x8x8xf32>
    %225 = tpu.transpose %224, [2, 0, 1] : vector<4x8x8xf32> -> vector<8x4x8xf32>
    "tpu.trace_stop"() : () -> ()
    %226 = vector.shape_cast %225 : vector<8x4x8xf32> to vector<8x32xf32>
    %cst_124 = arith.constant dense<0.000000e+00> : vector<8x32xf32>
    %227 = tpu.matmul %226, %166, %cst_124 {dimension_numbers = #tpu.dot_dimension_numbers<[1], [0], [0], [1], [0, 0, 1, 1], [], []>} : vector<8x32xf32>, vector<32x32xf32>, vector<8x32xf32> -> vector<8x32xf32>
    %228 = vector.broadcast %168 : vector<1x32xf32> to vector<8x32xf32>
    %229 = arith.addf %227, %228 : vector<8x32xf32>
    %230 = arith.addf %156, %229 : vector<8x32xf32>
    %cst_125 = arith.constant dense<0.000000e+00> : vector<8xf32>
    %231 = vector.multi_reduction <add>, %230, %cst_125 [1] : vector<8x32xf32> to vector<8xf32>
    %232 = vector.shape_cast %231 : vector<8xf32> to vector<8x1xf32>
    %cst_126 = arith.constant 3.200000e+01 : f32
    %233 = vector.broadcast %cst_126 : f32 to vector<8x1xf32>
    %234 = arith.divf %232, %233 : vector<8x1xf32>
    %235 = vector.broadcast %234 : vector<8x1xf32> to vector<8x32xf32>
    %236 = arith.subf %230, %235 : vector<8x32xf32>
    %237 = arith.mulf %236, %236 : vector<8x32xf32>
    %cst_127 = arith.constant dense<0.000000e+00> : vector<8xf32>
    %238 = vector.multi_reduction <add>, %237, %cst_127 [1] : vector<8x32xf32> to vector<8xf32>
    %239 = vector.shape_cast %238 : vector<8xf32> to vector<8x1xf32>
    %cst_128 = arith.constant 3.200000e+01 : f32
    %240 = vector.broadcast %cst_128 : f32 to vector<8x1xf32>
    %241 = arith.divf %239, %240 : vector<8x1xf32>
    %242 = vector.broadcast %234 : vector<8x1xf32> to vector<8x32xf32>
    %243 = arith.subf %230, %242 : vector<8x32xf32>
    %cst_129 = arith.constant 9.99999974E-6 : f32
    %244 = vector.broadcast %cst_129 : f32 to vector<8x1xf32>
    %245 = arith.addf %241, %244 : vector<8x1xf32>
    %246 = math.sqrt %245 : vector<8x1xf32>
    %247 = vector.broadcast %246 : vector<8x1xf32> to vector<8x32xf32>
    %248 = arith.divf %243, %247 : vector<8x32xf32>
    %249 = vector.broadcast %170 : vector<1x32xf32> to vector<8x32xf32>
    %250 = arith.mulf %248, %249 : vector<8x32xf32>
    %251 = vector.broadcast %172 : vector<1x32xf32> to vector<8x32xf32>
    %252 = arith.addf %250, %251 : vector<8x32xf32>
    %cst_130 = arith.constant dense<0.000000e+00> : vector<8x128xf32>
    %253 = tpu.matmul %252, %174, %cst_130 {dimension_numbers = #tpu.dot_dimension_numbers<[1], [0], [0], [1], [0, 0, 1, 1], [], []>} : vector<8x32xf32>, vector<32x128xf32>, vector<8x128xf32> -> vector<8x128xf32>
    %254 = vector.broadcast %176 : vector<1x128xf32> to vector<8x128xf32>
    %255 = arith.addf %253, %254 : vector<8x128xf32>
    %cst_131 = arith.constant 5.000000e-01 : f32
    %256 = vector.broadcast %cst_131 : f32 to vector<8x128xf32>
    %257 = arith.mulf %256, %255 : vector<8x128xf32>
    %cst_132 = arith.constant 0.707106769 : f32
    %258 = vector.broadcast %cst_132 : f32 to vector<8x128xf32>
    %259 = arith.mulf %255, %258 : vector<8x128xf32>
    %cst_133 = arith.constant 0.000000e+00 : f32
    %260 = vector.broadcast %cst_133 : f32 to vector<8x128xf32>
    %261 = arith.cmpf oge, %259, %260 : vector<8x128xf32>
    %cst_134 = arith.constant 1.000000e+00 : f32
    %cst_135 = arith.constant -1.000000e+00 : f32
    %262 = vector.broadcast %cst_134 : f32 to vector<8x128xf32>
    %263 = vector.broadcast %cst_135 : f32 to vector<8x128xf32>
    %264 = arith.select %261, %262, %263 : vector<8x128xi1>, vector<8x128xf32>
    %265 = math.absf %259 : vector<8x128xf32>
    %cst_136 = arith.constant 0.327591091 : f32
    %266 = vector.broadcast %cst_136 : f32 to vector<8x128xf32>
    %267 = arith.mulf %266, %265 : vector<8x128xf32>
    %cst_137 = arith.constant 1.000000e+00 : f32
    %268 = vector.broadcast %cst_137 : f32 to vector<8x128xf32>
    %269 = arith.addf %268, %267 : vector<8x128xf32>
    %cst_138 = arith.constant 1.000000e+00 : f32
    %270 = vector.broadcast %cst_138 : f32 to vector<8x128xf32>
    %271 = arith.divf %270, %269 : vector<8x128xf32>
    %cst_139 = arith.constant 1.06140542 : f32
    %272 = vector.broadcast %cst_139 : f32 to vector<8x128xf32>
    %273 = arith.mulf %272, %271 : vector<8x128xf32>
    %cst_140 = arith.constant -1.45315206 : f32
    %274 = vector.broadcast %cst_140 : f32 to vector<8x128xf32>
    %275 = arith.addf %273, %274 : vector<8x128xf32>
    %276 = arith.mulf %275, %271 : vector<8x128xf32>
    %cst_141 = arith.constant 1.42141378 : f32
    %277 = vector.broadcast %cst_141 : f32 to vector<8x128xf32>
    %278 = arith.addf %276, %277 : vector<8x128xf32>
    %279 = arith.mulf %278, %271 : vector<8x128xf32>
    %cst_142 = arith.constant -0.284496725 : f32
    %280 = vector.broadcast %cst_142 : f32 to vector<8x128xf32>
    %281 = arith.addf %279, %280 : vector<8x128xf32>
    %282 = arith.mulf %281, %271 : vector<8x128xf32>
    %cst_143 = arith.constant 0.254829586 : f32
    %283 = vector.broadcast %cst_143 : f32 to vector<8x128xf32>
    %284 = arith.addf %282, %283 : vector<8x128xf32>
    %285 = arith.mulf %284, %271 : vector<8x128xf32>
    %cst_144 = arith.constant 0.000000e+00 : f32
    %286 = vector.broadcast %cst_144 : f32 to vector<8x128xf32>
    %287 = arith.subf %286, %265 : vector<8x128xf32>
    %288 = arith.mulf %287, %265 : vector<8x128xf32>
    %289 = math.exp %288 : vector<8x128xf32>
    %290 = arith.mulf %285, %289 : vector<8x128xf32>
    %cst_145 = arith.constant 1.000000e+00 : f32
    %291 = vector.broadcast %cst_145 : f32 to vector<8x128xf32>
    %292 = arith.subf %291, %290 : vector<8x128xf32>
    %293 = arith.mulf %264, %292 : vector<8x128xf32>
    %cst_146 = arith.constant 1.000000e+00 : f32
    %294 = vector.broadcast %cst_146 : f32 to vector<8x128xf32>
    %295 = arith.addf %294, %293 : vector<8x128xf32>
    %296 = arith.mulf %257, %295 : vector<8x128xf32>
    %cst_147 = arith.constant dense<0.000000e+00> : vector<8x32xf32>
    %297 = tpu.matmul %296, %178, %cst_147 {dimension_numbers = #tpu.dot_dimension_numbers<[1], [0], [0], [1], [0, 0, 1, 1], [], []>} : vector<8x128xf32>, vector<128x32xf32>, vector<8x32xf32> -> vector<8x32xf32>
    %298 = vector.broadcast %180 : vector<1x32xf32> to vector<8x32xf32>
    %299 = arith.addf %297, %298 : vector<8x32xf32>
    %300 = arith.addf %230, %299 : vector<8x32xf32>
    %c0_148 = arith.constant 0 : index
    %c0_149 = arith.constant 0 : index
    %301 = vector.load %arg16[%c0_148, %c0_149] : memref<1x32xf32, #tpu.memory_space<vmem>>, vector<1x32xf32>
    %c0_150 = arith.constant 0 : index
    %c0_151 = arith.constant 0 : index
    %302 = vector.load %arg17[%c0_150, %c0_151] : memref<1x32xf32, #tpu.memory_space<vmem>>, vector<1x32xf32>
    %cst_152 = arith.constant dense<0.000000e+00> : vector<8xf32>
    %303 = vector.multi_reduction <add>, %300, %cst_152 [1] : vector<8x32xf32> to vector<8xf32>
    %304 = vector.shape_cast %303 : vector<8xf32> to vector<8x1xf32>
    %cst_153 = arith.constant 3.200000e+01 : f32
    %305 = vector.broadcast %cst_153 : f32 to vector<8x1xf32>
    %306 = arith.divf %304, %305 : vector<8x1xf32>
    %307 = vector.broadcast %306 : vector<8x1xf32> to vector<8x32xf32>
    %308 = arith.subf %300, %307 : vector<8x32xf32>
    %309 = arith.mulf %308, %308 : vector<8x32xf32>
    %cst_154 = arith.constant dense<0.000000e+00> : vector<8xf32>
    %310 = vector.multi_reduction <add>, %309, %cst_154 [1] : vector<8x32xf32> to vector<8xf32>
    %311 = vector.shape_cast %310 : vector<8xf32> to vector<8x1xf32>
    %cst_155 = arith.constant 3.200000e+01 : f32
    %312 = vector.broadcast %cst_155 : f32 to vector<8x1xf32>
    %313 = arith.divf %311, %312 : vector<8x1xf32>
    %314 = vector.broadcast %306 : vector<8x1xf32> to vector<8x32xf32>
    %315 = arith.subf %300, %314 : vector<8x32xf32>
    %cst_156 = arith.constant 9.99999974E-6 : f32
    %316 = vector.broadcast %cst_156 : f32 to vector<8x1xf32>
    %317 = arith.addf %313, %316 : vector<8x1xf32>
    %318 = math.sqrt %317 : vector<8x1xf32>
    %319 = vector.broadcast %318 : vector<8x1xf32> to vector<8x32xf32>
    %320 = arith.divf %315, %319 : vector<8x32xf32>
    %321 = vector.broadcast %301 : vector<1x32xf32> to vector<8x32xf32>
    %322 = arith.mulf %320, %321 : vector<8x32xf32>
    %323 = vector.broadcast %302 : vector<1x32xf32> to vector<8x32xf32>
    %324 = arith.addf %322, %323 : vector<8x32xf32>
    %c0_157 = arith.constant 0 : index
    %c0_158 = arith.constant 0 : index
    %325 = vector.load %arg18[%c0_157, %c0_158] : memref<32x32xf32, #tpu.memory_space<vmem>>, vector<32x32xf32>
    %cst_159 = arith.constant dense<0.000000e+00> : vector<8x32xf32>
    %326 = tpu.matmul %324, %325, %cst_159 {dimension_numbers = #tpu.dot_dimension_numbers<[1], [0], [0], [1], [0, 0, 1, 1], [], []>} : vector<8x32xf32>, vector<32x32xf32>, vector<8x32xf32> -> vector<8x32xf32>
    %c0_160 = arith.constant 0 : index
    %c0_161 = arith.constant 0 : index
    %327 = vector.load %arg19[%c0_160, %c0_161] : memref<1x32xf32, #tpu.memory_space<vmem>>, vector<1x32xf32>
    %328 = vector.broadcast %327 : vector<1x32xf32> to vector<8x32xf32>
    %329 = arith.addf %326, %328 : vector<8x32xf32>
    %c0_162 = arith.constant 0 : index
    %c0_163 = arith.constant 0 : index
    %c0_164 = arith.constant 0 : index
    %330 = vector.load %arg20[%c0_162, %c0_163, %c0_164] : memref<1x8x32xf32, #tpu.memory_space<vmem>>, vector<1x8x32xf32>
    %331 = vector.shape_cast %330 : vector<1x8x32xf32> to vector<8x32xf32>
    %332 = vector.shape_cast %329 : vector<8x32xf32> to vector<1x8x32xf32>
    tpu.vector_store %arg20[%c0_162, %c0_163, %c0_164], %332 {strides = array<i32>} : memref<1x8x32xf32, #tpu.memory_space<vmem>>, vector<1x8x32xf32>,
    return
  }
  func.func @transform_0(%arg0: i32) -> (i32, i32, i32) {
    %c0_i32 = arith.constant 0 : i32
    %c0_i32_0 = arith.constant 0 : i32
    %c0_i32_1 = arith.constant 0 : i32
    return %arg0, %c0_i32, %c0_i32_0 : i32, i32, i32
  }
  func.func @transform_1(%arg0: i32) -> (i32, i32, i32) {
    %c0_i32 = arith.constant 0 : i32
    %c0_i32_0 = arith.constant 0 : i32
    %c0_i32_1 = arith.constant 0 : i32
    return %arg0, %c0_i32, %c0_i32_0 : i32, i32, i32
  }
  func.func @transform_2(%arg0: i32) -> (i32, i32) {
    %c0_i32 = arith.constant 0 : i32
    %c0_i32_0 = arith.constant 0 : i32
    %c0_i32_1 = arith.constant 0 : i32
    return %c0_i32, %c0_i32_0 : i32, i32
  }
  func.func @transform_3(%arg0: i32) -> (i32, i32, i32) {
    %c0_i32 = arith.constant 0 : i32
    %c0_i32_0 = arith.constant 0 : i32
    %c0_i32_1 = arith.constant 0 : i32
    %c0_i32_2 = arith.constant 0 : i32
    return %c0_i32, %c0_i32_0, %c0_i32_1 : i32, i32, i32
  }
  func.func @transform_4(%arg0: i32) -> (i32, i32, i32) {
    %c0_i32 = arith.constant 0 : i32
    %c0_i32_0 = arith.constant 0 : i32
    %c0_i32_1 = arith.constant 0 : i32
    %c0_i32_2 = arith.constant 0 : i32
    return %c0_i32, %c0_i32_0, %c0_i32_1 : i32, i32, i32
  }
  func.func @transform_5(%arg0: i32) -> (i32, i32, i32) {
    %c0_i32 = arith.constant 0 : i32
    %c0_i32_0 = arith.constant 0 : i32
    %c0_i32_1 = arith.constant 0 : i32
    %c0_i32_2 = arith.constant 0 : i32
    return %c0_i32, %c0_i32_0, %c0_i32_1 : i32, i32, i32
  }
  func.func @transform_6(%arg0: i32) -> (i32, i32, i32) {
    %c0_i32 = arith.constant 0 : i32
    %c0_i32_0 = arith.constant 0 : i32
    %c0_i32_1 = arith.constant 0 : i32
    %c0_i32_2 = arith.constant 0 : i32
    return %c0_i32, %c0_i32_0, %c0_i32_1 : i32, i32, i32
  }
  func.func @transform_7(%arg0: i32) -> (i32, i32, i32) {
    %c0_i32 = arith.constant 0 : i32
    %c0_i32_0 = arith.constant 0 : i32
    %c0_i32_1 = arith.constant 0 : i32
    %c0_i32_2 = arith.constant 0 : i32
    return %c0_i32, %c0_i32_0, %c0_i32_1 : i32, i32, i32
  }
  func.func @transform_8(%arg0: i32) -> (i32, i32, i32) {
    %c0_i32 = arith.constant 0 : i32
    %c0_i32_0 = arith.constant 0 : i32
    %c0_i32_1 = arith.constant 0 : i32
    %c0_i32_2 = arith.constant 0 : i32
    return %c0_i32, %c0_i32_0, %c0_i32_1 : i32, i32, i32
  }
  func.func @transform_9(%arg0: i32) -> (i32, i32, i32) {
    %c0_i32 = arith.constant 0 : i32
    %c0_i32_0 = arith.constant 0 : i32
    %c0_i32_1 = arith.constant 0 : i32
    %c0_i32_2 = arith.constant 0 : i32
    return %c0_i32, %c0_i32_0, %c0_i32_1 : i32, i32, i32
  }
  func.func @transform_10(%arg0: i32) -> (i32, i32, i32) {
    %c0_i32 = arith.constant 0 : i32
    %c0_i32_0 = arith.constant 0 : i32
    %c0_i32_1 = arith.constant 0 : i32
    %c0_i32_2 = arith.constant 0 : i32
    return %c0_i32, %c0_i32_0, %c0_i32_1 : i32, i32, i32
  }
  func.func @transform_11(%arg0: i32) -> (i32, i32, i32) {
    %c0_i32 = arith.constant 0 : i32
    %c0_i32_0 = arith.constant 0 : i32
    %c0_i32_1 = arith.constant 0 : i32
    %c0_i32_2 = arith.constant 0 : i32
    return %c0_i32, %c0_i32_0, %c0_i32_1 : i32, i32, i32
  }
  func.func @transform_12(%arg0: i32) -> (i32, i32, i32) {
    %c0_i32 = arith.constant 0 : i32
    %c0_i32_0 = arith.constant 0 : i32
    %c0_i32_1 = arith.constant 0 : i32
    %c0_i32_2 = arith.constant 0 : i32
    return %c0_i32, %c0_i32_0, %c0_i32_1 : i32, i32, i32
  }
  func.func @transform_13(%arg0: i32) -> (i32, i32, i32) {
    %c0_i32 = arith.constant 0 : i32
    %c0_i32_0 = arith.constant 0 : i32
    %c0_i32_1 = arith.constant 0 : i32
    %c0_i32_2 = arith.constant 0 : i32
    return %c0_i32, %c0_i32_0, %c0_i32_1 : i32, i32, i32
  }
  func.func @transform_14(%arg0: i32) -> (i32, i32, i32) {
    %c0_i32 = arith.constant 0 : i32
    %c0_i32_0 = arith.constant 0 : i32
    %c0_i32_1 = arith.constant 0 : i32
    %c0_i32_2 = arith.constant 0 : i32
    return %c0_i32, %c0_i32_0, %c0_i32_1 : i32, i32, i32
  }
  func.func @transform_15(%arg0: i32) -> (i32, i32) {
    %c0_i32 = arith.constant 0 : i32
    %c0_i32_0 = arith.constant 0 : i32
    %c0_i32_1 = arith.constant 0 : i32
    return %c0_i32, %c0_i32_0 : i32, i32
  }
  func.func @transform_16(%arg0: i32) -> (i32, i32) {
    %c0_i32 = arith.constant 0 : i32
    %c0_i32_0 = arith.constant 0 : i32
    %c0_i32_1 = arith.constant 0 : i32
    return %c0_i32, %c0_i32_0 : i32, i32
  }
  func.func @transform_17(%arg0: i32) -> (i32, i32) {
    %c0_i32 = arith.constant 0 : i32
    %c0_i32_0 = arith.constant 0 : i32
    %c0_i32_1 = arith.constant 0 : i32
    return %c0_i32, %c0_i32_0 : i32, i32
  }
  func.func @transform_18(%arg0: i32) -> (i32, i32) {
    %c0_i32 = arith.constant 0 : i32
    %c0_i32_0 = arith.constant 0 : i32
    %c0_i32_1 = arith.constant 0 : i32
    return %c0_i32, %c0_i32_0 : i32, i32
  }
  func.func @transform_19(%arg0: i32) -> (i32, i32, i32) {
    %c0_i32 = arith.constant 0 : i32
    %c0_i32_0 = arith.constant 0 : i32
    %c0_i32_1 = arith.constant 0 : i32
    return %arg0, %c0_i32, %c0_i32_0 : i32, i32, i32
  }
}

</mosaic_0001>

<bundles_post_ra>
// kernel: tpu_custom_call.1
= control target key start
LH: loop header
LB: loop body
LE: loop exit
PB: predicated region body
PF: predicated region fallthrough
CT: control target
= control target key end

     0   :  { %s4054_s0 = inlined_call_operand.vmem [shape: f32[2,8,48], index: 0, kind: input, shape index: {}]   ;;  %s4055_s1 = inlined_call_operand.vmem [shape: f32[2,8,32], index: 1, kind: input, shape index: {}]   ;;  %s4056_s2 = inlined_call_operand.vmem [shape: f32[48,32], index: 2, kind: input, shape index: {}]   ;;  %s4057_s3 = inlined_call_operand.vmem [shape: f32[2,1,32], index: 3, kind: input, shape index: {}]   ;;  %s4058_s4 = inlined_call_operand.vmem [shape: f32[2,1,32], index: 4, kind: input, shape index: {}]   ;;  %s4059_s5 = inlined_call_operand.vmem [shape: f32[2,32,96], index: 5, kind: input, shape index: {}]   ;;  %s4060_s6 = inlined_call_operand.vmem [shape: f32[2,1,96], index: 6, kind: input, shape index: {}]   ;;  %s4061_s7 = inlined_call_operand.vmem [shape: f32[2,32,32], index: 7, kind: input, shape index: {}]   ;;  %s4062_s8 = inlined_call_operand.vmem [shape: f32[2,1,32], index: 8, kind: input, shape index: {}]   ;;  %s4063_s9 = inlined_call_operand.vmem [shape: f32[2,1,32], index: 9, kind: input, shape index: {}]   ;;  %s4064_s10 = inlined_call_operand.vmem [shape: f32[2,1,32], index: 10, kind: input, shape index: {}]   ;;  %s4065_s11 = inlined_call_operand.vmem [shape: f32[2,32,128], index: 11, kind: input, shape index: {}]   ;;  %s4066_s12 = inlined_call_operand.vmem [shape: f32[2,1,128], index: 12, kind: input, shape index: {}]   ;;  %s4067_s13 = inlined_call_operand.vmem [shape: f32[2,128,32], index: 13, kind: input, shape index: {}]   ;;  %s4068_s14 = inlined_call_operand.vmem [shape: f32[2,1,32], index: 14, kind: input, shape index: {}]   ;;  %s4069_s15 = inlined_call_operand.vmem [shape: f32[1,32], index: 15, kind: input, shape index: {}]   ;;  %s4070_s16 = inlined_call_operand.vmem [shape: f32[1,32], index: 16, kind: input, shape index: {}]   ;;  %s4071_s17 = inlined_call_operand.vmem [shape: f32[32,32], index: 17, kind: input, shape index: {}]   ;;  %s4072_s18 = inlined_call_operand.vmem [shape: f32[1,32], index: 18, kind: input, shape index: {}]   ;;  %s4073_s19 = inlined_call_operand.hbm [shape: f32[2,8,32], index: 19, kind: output, shape index: {}]  }
   0x1   :  { %4093 = sst [smem:[#allocation12_spill]] %s4054_s0 }
   0x2   :  { %4094 = sst [smem:[#allocation13_spill]] %s4055_s1 }
   0x3   :  { %4095 = sst [smem:[#allocation14_spill]] %s4056_s2 }
   0x4   :  { %4096 = sst [smem:[#allocation15_spill]] %s4057_s3 }
   0x5   :  { %4097 = sst [smem:[#allocation16_spill]] %s4058_s4 }
   0x6   :  { %4098 = sst [smem:[#allocation17_spill]] %s4059_s5 }
   0x7   :  { %4099 = sst [smem:[#allocation18_spill]] %s4072_s18 }
   0x8   :  { %24 = vsyncpa [#allocation3], 0 }
   0x9   :  { %26 = vsyncpa [#allocation3 + $0x1], 0  ;;  %s3466_s0 = smov 0   ;;  %s3468_s30 = smov 0  }
   0xa   :  { %s3470_s20 = smov 0   ;;  %s3472_s21 = smov 0  }
   0xb LB: > { %4100 = sst [smem:[#allocation5_spill]] %s3339_s0  ;;  %s3487_s1 = sadd.s32 4294967295, %s3351_s21   ;;  %s3351_s21 = sphi %s3472_s21, %s4127_s21   ;;  %s3347_s20 = sphi %s3470_s20, %s4129_s20   ;;  %s3343_s30 = sphi %s3468_s30, %s4131_s30   ;;  %s3339_s0 = sphi %s3466_s0, %s4130_s0  }
   0xc   : > { %4101 = sst [smem:[#allocation6_spill]] %s3347_s20  ;;  %s3040_s22 = sadd.s32 4294967294, %s3351_s21  }
   0xd   : > { %4102 = sst [smem:[#allocation7_spill]] %s3351_s21  ;;  %s3491_s2 = sadd.s32 1, %s3351_s21  }
   0xe   : > { %4103 = sst [smem:[#allocation8_spill]] %s3491_s2  ;;  %s448_s23 = sadd.s32 1, %s3347_s20 }
   0xf   : > { %s445_s24 = ssub.s32 %s3351_s21, %s3491_s2  ;;  %p458_p0 = scmp.ne.s32.totalorder %s3347_s20, %s3343_s30 }
  0x10   : > { %p446_p1 = scmp.eq.s32.totalorder %s445_s24, 0  ;;  %p459_p2 = scmp.eq.s32.totalorder %s3487_s1, 1 }
  0x11   : > { %p464_p3 = scmp.ne.s32.totalorder %s3343_s30, %s3339_s0  ;;  %p465_p4 = scmp.eq.s32.totalorder %s3040_s22, 1 }
  0x12   : > { %s3502_s25 = scalar_select %p446_p1, %s3347_s20, %s448_s23  }
  0x13   : > { %p3504_p5 = por %p459_p2, %p458_p0  ;;  %p3508_p6 = por %p465_p4, %p464_p3 }
  0x14   : > { %4104 = sst [smem:[#allocation9_spill]] %s3502_s25  ;;  %p3043_p7 = scmp.ge.s32.totalorder %s3351_s21, 1 }
  0x15   : > { %s4105_s3 = scalar_select %p3504_p5, 1, 0 }
  0x16   : > { %s4107_s26 = scalar_select %p3508_p6, 1, 0 }
  0x17   : > { %4106 = sst [smem:[#allocation10_spill]] %s4105_s3  ;;  %p548_p8 = scmp.lt.s32.totalorder %s3351_s21, 3 }
  0x18   : > { %4108 = sst [smem:[#allocation11_spill]] %s4107_s26 }
  0x19   : > { %p549_p9 = pnand %p3043_p7, %p548_p8 }
  0x1a   : > { %s4109_s29 = sld [smem:[#allocation14_spill]] (!%p549_p9)  ;;  %p607_p10 = scmp.lt.s32.totalorder (!%p549_p9), %s3487_s1, 1 }
  0x1b   : > { %552 = sbr.rel (%p549_p9) target bundleno = 5527 (0x1597), region = 96  ;;  %s4110_s25 = sld [smem:[#allocation12_spill]] (!%p549_p9) }
  0x1c   : > { %s4111_s26 = sld [smem:[#allocation13_spill]] (!%p549_p9)  ;;  %s3356_s28 = smov (!%p549_p9), 112  }
  0x1d   : > { %s4112_s5 = sld [smem:[#allocation17_spill]] (!%p549_p9)  ;;  %s4088_s22 = smov (!%p549_p9), 96  }
  0x1e   : > { %s4115_s4 = sld [smem:[#allocation16_spill]] (!%p549_p9)  ;;  %s4085_s23 = smov (!%p549_p9), 64  }
  0x1f   : > { %s4116_s0 = smov (!%p549_p9), 104   ;;  %s4117_s21 = smov (!%p549_p9), 96  }
  0x20   : > { %v621_v0 = vld [vmem:[%s4109_s29 + $0x28] sm:$0xff]  ;;  %v620_v1 = vld [vmem:[%s4109_s29 + $0x20] sm:$0xff]  ;;  %v619_v2 = vld [vmem:[%s4109_s29 + $0x18] sm:$0xff]  ;;  %s608_s20 = scalar_select %p607_p10, %s3487_s1, 1  ;;  %vm623_vm0 = vcmask 392192   ;;  %vm687_vm1 = vcmask 261120  }
  0x21   : > { %637 = vmatpush.msra.mxu0 %v621_v0  ;;  %v618_v3 = vld [vmem:[%s4109_s29 + $0x10] sm:$0xff]  ;;  %v617_v4 = vld [vmem:[%s4109_s29 + $0x8] sm:$0xff]  ;;  %v616_v5 = vld [vmem:[%s4109_s29] sm:$0xff]  ;;  %v3353_v11 = vmov 32.0   ;;  %vm914_vm9 = vcmask 64512  }
  0x22   : > { %s3045_s27 = sshll.u32 %s608_s20, 3  ;;  %3227 = vrcp.f32 %v3353_v11  ;;  %s4113_s20 = sld [smem:[#allocation15_spill]]  ;;  %v3210_v55 = vld [vmem:[%s4060_s6] ss:$0 sm:$0xff] }
  0x23   : > { %638 = vmatpush.msra.mxu0 %v620_v1  ;;  %s610_s24 = scalar_lea.vmem %s4110_s25, %s3045_s27  ;;  %s614_s3 = scalar_lea.vmem %s4111_s26, %s3045_s27  ;;  %v656_v23 = vld [vmem:[%s4112_s5 + $0x18] sm:$0xff]  ;;  %v655_v24 = vld [vmem:[%s4112_s5 + $0x10] sm:$0xff]  ;;  %v654_v25 = vld [vmem:[%s4112_s5 + $0x8] sm:$0xff] }
  0x24   : > { %v615_v6 = vld [vmem:[%s610_s24] sm:$0xff]  ;;  %759 = vmatpush.msra.mxu1 %v656_v23  ;;  %s3355_s27 = smov 120   ;;  %s4084_s25 = smov 16  }
  0x25   : > { %639 = vmatpush.msra.mxu0 %v619_v2  ;;  %v622_v7 = vld [vmem:[%s614_s3] sm:$0xff]  ;;  %s4091_s3 = smov 104   ;;  %s4087_s24 = smov 24  }
  0x26   : > { %760 = vmatpush.msra.mxu1 %v655_v24  ;;  %v653_v26 = vld [vmem:[%s4112_s5] sm:$0xff] }
  0x27   : > { %640 = vmatpush.msra.mxu0 %v618_v3  ;;  %v3209_v52 = vld [vmem:[%s4115_s4] ss:$0 sm:$0xff] }
  0x28   : > { %v3228_v12 = vpop.eup %3227  ;;  %761 = vmatpush.msra.mxu1 %v654_v25  ;;  %s4114_s2 = smov %s4113_s20  ;;  %v3208_v49 = vld [vmem:[%s4113_s20] ss:$0 sm:$0xff]  ;;  %s4090_s20 = smov 8  }
  0x29   : > { %641 = vmatpush.msra.mxu0 %v617_v4  ;;  %v692_v13 = vmul.f32 32.0, %v3228_v12  ;;  %vm696_vm2 = vweird.f32 %v3228_v12 }
  0x2a   : > { %762 = vmatpush.msra.mxu1 %v653_v26 }
  0x2b   : > { %642 = vmatpush.msra.mxu0 %v616_v5  ;;  %v693_v14 = vsub.f32 1.0, %v692_v13 }
  0x2c   : > { %3047 = vmatmul.msk.f32.vlgmr.msra.gmra.mxu0 %vm623_vm0, %v615_v6 }
  0x2d   : > { %v694_v15 = vmul.f32 %v3228_v12, %v693_v14 }
  0x2f   : > { %v695_v16 = vadd.f32 %v3228_v12, %v694_v15 }
  0x31   : > { %v3544_v17 = vsel %vm696_vm2, %v3228_v12, %v695_v16 }
  0xa9   : > { %v644_v8 = vpop.f32.mrf.mxu0 }
  0xaa   : > { %v3540_v9 = vadd.f32 %v644_v8, %v622_v7  ;;  %v647_v7 = vlaneseq }
  0xac   : > { %v688_v10 = vsel %vm687_vm1, %v3540_v9, 0.0  ;;  %v648_v8 = vand.u32 127, %v647_v7 }
  0xad   : > { %689 = vadd.xlane.f32.xlu0 %v688_v10  ;;  %v3359_v10 = vmov -1e+30  }
  0xae   : > { %vm649_vm10 = vcmp.lt.s32.totalorder %v648_v8, 5 }
  0xaf   : > { %v3582_v11 = vsel %vm649_vm10, 0.0, %v3359_v10 }
 0x120   : > { %v690_v18 = vpop.xlane.xlu0 %689 }
 0x121   : > { %v698_v19 = vmul.f32 %v3544_v17, %v690_v18 }
 0x123   : > { %v699_v20 = vsub.f32 %v3540_v9, %v698_v19 }
 0x125   : > { %v700_v21 = vmul.f32 %v699_v20, %v699_v20 }
 0x127   : > { %v701_v22 = vsel %vm687_vm1, %v700_v21, 0.0 }
 0x128   : > { %702 = vadd.xlane.f32.xlu0 %v701_v22 }
 0x19b   : > { %v703_v27 = vpop.xlane.xlu0 %702 }
 0x19c   : > { %v704_v28 = vmul.f32 %v703_v27, %v3544_v17 }
 0x19e   : > { %v705_v29 = vadd.f32 1e-05, %v704_v28 }
 0x1a0   : > { %3229 = vrsqrt.f32 %v705_v29  ;;  %vm713_vm3 = vcmp.eq.f32.partialorder %v705_v29, inf  ;;  %v716_v37 = vand.u32 2147483648, %v705_v29  ;;  %vm715_vm4 = vcmp.eq.f32.partialorder %v705_v29, 0.0 }
 0x1a6   : > { %v3230_v30 = vpop.eup %3229 }
 0x1a7   : > { %v707_v31 = vmul.f32 %v3230_v30, %v705_v29 }
 0x1a9   : > { %v708_v32 = vmul.f32 %v3230_v30, %v707_v31 }
 0x1ab   : > { %v709_v33 = vmul.f32 0.5, %v708_v32 }
 0x1ad   : > { %v710_v34 = vsub.f32 1.5, %v709_v33 }
 0x1af   : > { %v711_v35 = vmul.f32 %v3230_v30, %v710_v34 }
 0x1b1   : > { %v712_v36 = vmul.f32 %v711_v35, %v705_v29 }
 0x1b3   : > { %v714_v38 = vsel %vm713_vm3, %v705_v29, %v712_v36 }
 0x1b4   : > { %v717_v39 = vsel %vm715_vm4, %v716_v37, %v714_v38 }
 0x1b5   : > { %3231 = vrcp.f32 %v717_v39  ;;  %v729_v43 = vand.u32 2147483648, %v717_v39  ;;  %v727_v45 = vand.u32 2147483647, %v717_v39  ;;  %vm723_vm6 = vweird.f32 %v717_v39 }
 0x1b7   : > { %v730_v47 = vor.u32 1.1754944e-38, %v729_v43  ;;  %vm728_vm8 = vcmp.eq.f32.partialorder %v727_v45, 8.507059e+37 }
 0x1bb   : > { %v3232_v40 = vpop.eup %3231 }
 0x1bc   : > { %v719_v41 = vmul.f32 %v3232_v40, %v717_v39  ;;  %vm724_vm5 = vweird.f32 %v3232_v40 }
 0x1bd   : > { %vm725_vm7 = vmor %vm723_vm6, %vm724_vm5 }
 0x1be   : > { %v720_v42 = vsub.f32 1.0, %v719_v41 }
 0x1c0   : > { %v721_v44 = vmul.f32 %v3232_v40, %v720_v42 }
 0x1c2   : > { %v722_v46 = vadd.f32 %v3232_v40, %v721_v44 }
 0x1c4   : > { %v726_v48 = vsel %vm725_vm7, %v3232_v40, %v722_v46 }
 0x1c5   : > { %v731_v50 = vsel %vm728_vm8, %v730_v47, %v726_v48 }
 0x1c6   : > { %v732_v51 = vmul.f32 %v731_v50, %v699_v20 }
 0x1c8   : > { %v736_v53 = vmul.f32 %v3208_v49, %v732_v51 }
 0x1ca   : > { %v740_v54 = vadd.f32 %v3209_v52, %v736_v53 }
 0x1cc   : > { %3048 = vmatmul.msk.f32.vlgmr.msra.gmra.mxu1 %vm687_vm1, %v740_v54 }
 0x249   : > { %v764_v56 = vpop.f32.mrf.mxu1 }
 0x24a   : > { %v765_v57 = vadd.f32 %v3210_v55, %v764_v56 }
 0x24c   : > { %772 = vrot.lane.b32.xlu2 %v765_v57, %s4091_s3  ;;  %768 = vrot.lane.b32.xlu1 %v765_v57, %s3355_s27 }
 0x254   : > { %770 = vrot.lane.b32.xlu1 %v765_v57, %s3356_s28 }
 0x2a6   : > { %v773_v58 = vpop.permute.xlu2 %772 }
 0x2a7   : > { %v3177_v59 = vpack.i.bf16 %v773_v58, %v765_v57 }
 0x2a9   : > { %3178 = vrot.lane.b32.xlu0 %v3177_v59, %s4088_s22 }
 0x2be   : > { %v769_v60 = vpop.permute.xlu1 %768 }
 0x2c6   : > { %v771_v61 = vpop.permute.xlu1 %770 }
 0x2c7   : > { %v3172_v62 = vpack.i.bf16 %v771_v61, %v769_v60  ;;  %1103 = vrot.lane.b32.xlu0 %v771_v61, %s4085_s23 }
 0x2c9   : > { %3173 = vrot.lane.b32.xlu2 %v3172_v62, %s4088_s22  ;;  %s3116_s22 = sshll.u32 %s3487_s1, 3 }
 0x2ca   : > { %s2964_s26 = scalar_lea.hbm %s4073_s19, %s3116_s22 }
 0x31b   : > { %v3179_v63 = vpop.permute.xlu0 %3178 }
 0x31c   : > { %3190 = vxpose.xlu2.b32.start.end [1/1] (short) (narrow) %v3179_v63, 8 }
 0x323   : > { %v3174_v0 = vpop.permute.xlu2 %3173 }
 0x324   : > { %3183 = vxpose.xlu1.b32.start.end [1/1] (short) (narrow) %v3174_v0, 8 }
 0x339   : > { %v1104_v30 = vpop.permute.xlu0 %1103 }
 0x3b5   : > { %v3191_v1 = vpop.trf.xlu2 }
 0x3b6   : > { %v3192_v2 = vunpack.i.l.bf16 %v3191_v1  ;;  %v3195_v4 = vunpack.i.h.bf16 %v3191_v1 }
 0x3b8   : > { %932 = vmatpush.msrb.mxu0 %v3192_v2 }
 0x3b9   : > { %3049 = vmatmul.msk.f32.vlgmr.msrb.gmra.mxu0 %vm914_vm9, %v765_v57 }
 0x3c8   : > { %v3184_v3 = vpop.trf.xlu1 }
 0x3c9   : > { %v3185_v5 = vunpack.i.l.bf16 %v3184_v3  ;;  %v3188_v6 = vunpack.i.h.bf16 %v3184_v3 }
 0x3cb   : > { %954 = vmatpush.msra.mxu3 %v3185_v5  ;;  %976 = vmatpush.msra.mxu2 %v3188_v6 }
 0x3cc   : > { %3050 = vmatmul.msk.f32.vlgmr.msra.gmra.mxu3 %vm914_vm9, %v769_v60  ;;  %3051 = vmatmul.msk.f32.vlgmr.msra.gmra.mxu2 %vm914_vm9, %v771_v61 }
 0x3cd   : > { %998 = vmatpush.msrb.mxu3 %v3195_v4 }
 0x3d4   : > { %3052 = vmatmul.msk.f32.vlgmr.msrb.gmra.mxu3 %vm914_vm9, %v773_v58 }
 0x436   : > { %v934_v12 = vpop.f32.mrf.mxu0 }
 0x437   : > { %v935_v13 = vadd.f32 %v934_v12, %v3582_v11 }
 0x439   : > { %v1003_v14 = vsel %vm914_vm9, %v935_v13, -inf }
 0x43a   : > { %1004 = vmax.xlane.f32.xlu2 %v1003_v14 }
 0x44f   : > { %v956_v15 = vpop.f32.mrf.mxu3  ;;  %v978_v16 = vpop.f32.mrf.mxu2 }
 0x450   : > { %v979_v18 = vadd.f32 %v978_v16, %v3582_v11  ;;  %v957_v20 = vadd.f32 %v956_v15, %v3582_v11 }
 0x452   : > { %1105 = vrot.lane.b32.xlu2 %v773_v58, %s4085_s23  ;;  %v1009_v19 = vsel %vm914_vm9, %v979_v18, -inf  ;;  %v1006_v24 = vsel %vm914_vm9, %v957_v20, -inf }
 0x453   : > { %1010 = vmax.xlane.f32.xlu0 %v1009_v19 }
 0x457   : > { %v1000_v21 = vpop.f32.mrf.mxu3 }
 0x458   : > { %v1001_v22 = vadd.f32 %v1000_v21, %v3582_v11 }
 0x45a   : > { %v1012_v23 = vsel %vm914_vm9, %v1001_v22, -inf }
 0x45b   : > { %1013 = vmax.xlane.f32.xlu1 %v1012_v23  ;;  %1007 = vmax.xlane.f32.xlu0 %v1006_v24 }
 0x46f   : > { %1099 = vrot.lane.b32.xlu0 %v765_v57, %s4085_s23 }
 0x474   : > { %1101 = vrot.lane.b32.xlu1 %v769_v60, %s4085_s23  ;;  %s4120_s23 = smov 24  }
 0x4ad   : > { %v1005_v25 = vpop.xlane.xlu2 %1004 }
 0x4ae   : > { %v1015_v26 = vsub.f32 %v935_v13, %v1005_v25 }
 0x4b0   : > { %v1019_v27 = vmul.f32 1.442695, %v1015_v26 }
 0x4b2   : > { %3233 = vpow2.f32 %v1019_v27 }
 0x4b5   : > { %v1106_v48 = vpop.permute.xlu2 %1105 }
 0x4b8   : > { %v3234_v28 = vpop.eup %3233 }
 0x4b9   : > { %v1027_v29 = vsel %vm914_vm9, %v3234_v28, 0.0 }
 0x4ba   : > { %1028 = vadd.xlane.f32.xlu0 %v1027_v29 }
 0x4c6   : > { %v1011_v31 = vpop.xlane.xlu0 %1010 }
 0x4c7   : > { %v1017_v32 = vsub.f32 %v979_v18, %v1011_v31 }
 0x4c9   : > { %v1023_v33 = vmul.f32 1.442695, %v1017_v32 }
 0x4cb   : > { %3235 = vpow2.f32 %v1023_v33 }
 0x4ce   : > { %v1014_v34 = vpop.xlane.xlu1 %1013  ;;  %v1008_v35 = vpop.xlane.xlu0 %1007 }
 0x4cf   : > { %v1018_v36 = vsub.f32 %v1001_v22, %v1014_v34  ;;  %v1016_v37 = vsub.f32 %v957_v20, %v1008_v35 }
 0x4d1   : > { %v3596_v38 = vpop.eup %3235  ;;  %v1025_v39 = vmul.f32 1.442695, %v1018_v36  ;;  %v1021_v40 = vmul.f32 1.442695, %v1016_v37 }
 0x4d2   : > { %v1033_v41 = vsel %vm914_vm9, %v3596_v38, 0.0 }
 0x4d3   : > { %3237 = vpow2.f32 %v1025_v39  ;;  %1034 = vadd.xlane.f32.xlu0 %v1033_v41 }
 0x4d4   : > { %3239 = vpow2.f32 %v1021_v40 }
 0x4d9   : > { %v3600_v42 = vpop.eup %3237 }
 0x4da   : > { %v3602_v43 = vpop.eup %3239  ;;  %v1036_v44 = vsel %vm914_vm9, %v3600_v42, 0.0 }
 0x4db   : > { %1037 = vadd.xlane.f32.xlu0 %v1036_v44  ;;  %v1030_v45 = vsel %vm914_vm9, %v3602_v43, 0.0 }
 0x4dc   : > { %1031 = vadd.xlane.f32.xlu1 %v1030_v45  ;;  %v3360_v45 = vmov 1983009808  }
 0x4e1   : > { %v1100_v46 = vpop.permute.xlu0 %1099 }
 0x4e2   : > { %1111 = vxpose.xlu2.b32.start.end [1/1] (short) (narrow) %v1100_v46, 8  ;;  %v1477_v46 = vunpack.c.l.s4 %v3360_v45 }
 0x4e6   : > { %v1102_v47 = vpop.permute.xlu1 %1101 }
 0x504   : > { %1175 = vxpose.xlu0.b32.start.end [1/1] (short) (narrow) %v1104_v30, 8 }
 0x50c   : > { %1143 = vxpose.xlu0.b32.start.end [1/1] (short) (narrow) %v1102_v47, 8 }
 0x516   : > { %1207 = vxpose.xlu1.b32.start.end [1/1] (short) (narrow) %v1106_v48, 8 }
 0x52d   : > { %v1029_v49 = vpop.xlane.xlu0 %1028 }
 0x52e   : > { %3241 = vrcp.f32 %v1029_v49  ;;  %v1050_v53 = vand.u32 2147483648, %v1029_v49  ;;  %v1048_v55 = vand.u32 2147483647, %v1029_v49  ;;  %vm1044_vm12 = vweird.f32 %v1029_v49 }
 0x530   : > { %v1051_v57 = vor.u32 1.1754944e-38, %v1050_v53  ;;  %vm1049_vm14 = vcmp.eq.f32.partialorder %v1048_v55, 8.507059e+37  ;;  %v3361_v55 = vmov 1934713408  }
 0x534   : > { %v3242_v50 = vpop.eup %3241 }
 0x535   : > { %v1040_v51 = vmul.f32 %v3242_v50, %v1029_v49  ;;  %vm1045_vm11 = vweird.f32 %v3242_v50 }
 0x536   : > { %vm1046_vm13 = vmor %vm1044_vm12, %vm1045_vm11 }
 0x537   : > { %v1041_v52 = vsub.f32 1.0, %v1040_v51 }
 0x539   : > { %v1042_v54 = vmul.f32 %v3242_v50, %v1041_v52 }
 0x53b   : > { %v1043_v56 = vadd.f32 %v3242_v50, %v1042_v54 }
 0x53d   : > { %v1047_v58 = vsel %vm1046_vm13, %v3242_v50, %v1043_v56  ;;  %vm1472_vm13 = vcmask 1047556   ;;  %v3619_v50 = vunpack.c.0.s8 %v1477_v46  ;;  %v1501_v56 = vunpack.c.l.s4 %v3361_v55 }
 0x53e   : > { %v1052_v59 = vsel %vm1049_vm14, %v1051_v57, %v1047_v58  ;;  %vm1595_vm14 = vcmask 130048  }
 0x53f   : > { %v1053_v60 = vmul.f32 %v3234_v28, %v1052_v59 }
 0x541   : > { %3053 = vmatpush.xpose.msk.msrb.mxu1 %vm914_vm9, %v1053_v60  ;;  %v3625_v60 = vunpack.c.0.s8 %v1501_v56  ;;  %v661_v56 = vld [vmem:[%s4061_s7 + $0x18] sm:$0xff] }
 0x546   : > { %v1035_v61 = vpop.xlane.xlu0 %1034 }
 0x547   : > { %3243 = vrcp.f32 %v1035_v61  ;;  %v1080_v3 = vand.u32 2147483648, %v1035_v61  ;;  %v1078_v5 = vand.u32 2147483647, %v1035_v61  ;;  %vm1074_vm0 = vweird.f32 %v1035_v61 }
 0x549   : > { %v1081_v8 = vor.u32 1.1754944e-38, %v1080_v3  ;;  %vm1079_vm3 = vcmp.eq.f32.partialorder %v1078_v5, 8.507059e+37 }
 0x54d   : > { %v3244_v62 = vpop.eup %3243 }
 0x54e   : > { %v1070_v63 = vmul.f32 %v3244_v62, %v1035_v61  ;;  %v1038_v0 = vpop.xlane.xlu0 %1037  ;;  %vm1075_vm15 = vweird.f32 %v3244_v62 }
 0x54f   : > { %v1032_v1 = vpop.xlane.xlu1 %1031  ;;  %3245 = vrcp.f32 %v1038_v0  ;;  %vm1076_vm2 = vmor %vm1074_vm0, %vm1075_vm15  ;;  %v1095_v20 = vand.u32 2147483648, %v1038_v0  ;;  %v1093_v23 = vand.u32 2147483647, %v1038_v0  ;;  %vm1089_vm6 = vweird.f32 %v1038_v0 }
 0x550   : > { %v1071_v2 = vsub.f32 1.0, %v1070_v63  ;;  %3247 = vrcp.f32 %v1032_v1  ;;  %v1065_v21 = vand.u32 2147483648, %v1032_v1  ;;  %v1063_v25 = vand.u32 2147483647, %v1032_v1 }
 0x551   : > { %vm1059_vm7 = vweird.f32 %v1032_v1  ;;  %v1096_v28 = vor.u32 1.1754944e-38, %v1095_v20  ;;  %vm1094_vm11 = vcmp.eq.f32.partialorder %v1093_v23, 8.507059e+37  ;;  %vm1597_vm15 = vcmask 195584  }
 0x552   : > { %v1072_v4 = vmul.f32 %v3244_v62, %v1071_v2  ;;  %v1066_v29 = vor.u32 1.1754944e-38, %v1065_v21  ;;  %vm1064_vm12 = vcmp.eq.f32.partialorder %v1063_v25, 8.507059e+37 }
 0x554   : > { %v1073_v6 = vadd.f32 %v3244_v62, %v1072_v4 }
 0x555   : > { %v3246_v7 = vpop.eup %3245 }
 0x556   : > { %v3248_v10 = vpop.eup %3247  ;;  %v1077_v12 = vsel %vm1076_vm2, %v3244_v62, %v1073_v6  ;;  %v1085_v13 = vmul.f32 %v3246_v7, %v1038_v0  ;;  %vm1090_vm4 = vweird.f32 %v3246_v7 }
 0x557   : > { %v1082_v14 = vsel %vm1079_vm3, %v1081_v8, %v1077_v12  ;;  %v1055_v15 = vmul.f32 %v3248_v10, %v1032_v1  ;;  %vm1060_vm5 = vweird.f32 %v3248_v10  ;;  %vm1091_vm8 = vmor %vm1089_vm6, %vm1090_vm4 }
 0x558   : > { %v1086_v16 = vsub.f32 1.0, %v1085_v13  ;;  %v1083_v18 = vmul.f32 %v3596_v38, %v1082_v14  ;;  %vm1061_vm10 = vmor %vm1059_vm7, %vm1060_vm5 }
 0x559   : > { %v1056_v19 = vsub.f32 1.0, %v1055_v15 }
 0x55a   : > { %v1087_v22 = vmul.f32 %v3246_v7, %v1086_v16  ;;  %3057 = vmatpush.xpose.msk.msra.mxu3 %vm914_vm9, %v1083_v18 }
 0x55b   : > { %v1057_v24 = vmul.f32 %v3248_v10, %v1056_v19 }
 0x55c   : > { %v1088_v26 = vadd.f32 %v3246_v7, %v1087_v22 }
 0x55d   : > { %v1058_v27 = vadd.f32 %v3248_v10, %v1057_v24 }
 0x55e   : > { %v1092_v30 = vsel %vm1091_vm8, %v3246_v7, %v1088_v26 }
 0x55f   : > { %v1062_v31 = vsel %vm1061_vm10, %v3248_v10, %v1058_v27  ;;  %v1097_v32 = vsel %vm1094_vm11, %v1096_v28, %v1092_v30 }
 0x560   : > { %v1067_v33 = vsel %vm1064_vm12, %v1066_v29, %v1062_v31  ;;  %v1098_v34 = vmul.f32 %v3600_v42, %v1097_v32 }
 0x561   : > { %v1068_v35 = vmul.f32 %v3602_v43, %v1067_v33 }
 0x562   : > { %3059 = vmatpush.xpose.msk.msra.mxu0 %vm914_vm9, %v1098_v34 }
 0x563   : > { %3055 = vmatpush.xpose.msk.msra.mxu1 %vm914_vm9, %v1068_v35 }
 0x57b   : > { %v1127_v36 = vpop.trf.xlu2 }
 0x57c   : > { %3054 = vmatmul.msk.f32.vlgmr.msrb.gmra.mxu1 %vm914_vm9, %v1127_v36 }
 0x57d   : > { %1617 = vmatpush.msrb.mxu1 %v661_v56 }
 0x5a8   : > { %v1191_v37 = vpop.trf.xlu0 }
 0x5a9   : > { %3058 = vmatmul.msk.f32.vlgmr.msra.gmra.mxu3 %vm914_vm9, %v1191_v37 }
 0x5b0   : > { %v1159_v38 = vpop.trf.xlu0 }
 0x5b1   : > { %3056 = vmatmul.msk.f32.vlgmr.msra.gmra.mxu1 %vm914_vm9, %v1159_v38 }
 0x5ba   : > { %v1223_v39 = vpop.trf.xlu1 }
 0x5bb   : > { %3060 = vmatmul.msk.f32.vlgmr.msra.gmra.mxu0 %vm914_vm9, %v1223_v39 }
 0x5f9   : > { %v1262_v40 = vpop.f32.mrf.mxu1 }
 0x5fa   : > { %1343 = vxpose.xlu2.b32.start.end [1/1] (short) (narrow) %v1262_v40, 8 }
 0x62c   : > { %v1314_v41 = vpop.f32.mrf.mxu3 }
 0x62d   : > { %1407 = vxpose.xlu0.b32.start.end [1/1] (short) (narrow) %v1314_v41, 8 }
 0x62e   : > { %v1288_v42 = vpop.f32.mrf.mxu1 }
 0x62f   : > { %1375 = vxpose.xlu2.b32.start.end [1/1] (short) (narrow) %v1288_v42, 8 }
 0x638   : > { %v1340_v43 = vpop.f32.mrf.mxu0 }
 0x639   : > { %1439 = vxpose.xlu0.b32.start.end [1/1] (short) (narrow) %v1340_v43, 8 }
 0x693   : > { %v1359_v44 = vpop.trf.xlu2 }
 0x694   : > { %v1474_v48 = vrot.slane %v1359_v44, 4 }
 0x6c8   : > { %v1391_v51 = vpop.trf.xlu2 }
 0x6c9   : > { %v1486_v54 = vrot.slane %v1391_v51, 4 }
 0x6d1   : > { %v1423_v47 = vpop.trf.xlu0 }
 0x6d2   : > { %v1471_v49 = vrot.slane %v1423_v47, 4  ;;  %v1475_v52 = vsel %vm1472_vm13, %v1423_v47, %v1474_v48 }
 0x6d3   : > { %v1483_v57 = vperm.slane %v1475_v52, %v3619_v50 }
 0x6d4   : > { %v1473_v53 = vsel %vm1472_vm13, %v1471_v49, %v1359_v44 }
 0x6d5   : > { %v1479_v58 = vperm.slane %v1473_v53, %v3619_v50  ;;  %v1510_v63 = vrot.slane %v1483_v57, 4 }
 0x6d7   : > { %v1498_v2 = vrot.slane %v1479_v58, 4 }
 0x6dd   : > { %v1455_v59 = vpop.trf.xlu0 }
 0x6de   : > { %v1484_v61 = vrot.slane %v1455_v59, 4  ;;  %v1487_v62 = vsel %vm1472_vm13, %v1455_v59, %v1486_v54  ;;  %v658_v59 = vld [vmem:[%s4061_s7] sm:$0xff] }
 0x6df   : > { %v1495_v0 = vperm.slane %v1487_v62, %v3619_v50 }
 0x6e0   : > { %v1485_v1 = vsel %vm1472_vm13, %v1484_v61, %v1391_v51 }
 0x6e1   : > { %v1491_v3 = vperm.slane %v1485_v1, %v3619_v50  ;;  %v1508_v4 = vrot.slane %v1495_v0, 4  ;;  %v1511_v5 = vsel %vm1472_vm13, %v1495_v0, %v1510_v63 }
 0x6e2   : > { %v1519_v6 = vperm.slane %v1511_v5, %v3625_v60 }
 0x6e3   : > { %v1496_v7 = vrot.slane %v1491_v3, 4  ;;  %v1499_v8 = vsel %vm1472_vm13, %v1491_v3, %v1498_v2  ;;  %v1509_v10 = vsel %vm1472_vm13, %v1508_v4, %v1483_v57  ;;  %v660_v57 = vld [vmem:[%s4061_s7 + $0x10] sm:$0xff]  ;;  %v3211_v3 = vld [vmem:[%s4062_s8] ss:$0 sm:$0xff] }
 0x6e4   : > { %v1507_v12 = vperm.slane %v1499_v8, %v3625_v60  ;;  %v1515_v13 = vperm.slane %v1509_v10, %v3625_v60  ;;  %v1526_v14 = vrot.slane %v1519_v6, 4  ;;  %1618 = vmatpush.msrb.mxu1 %v660_v57  ;;  %v680_v57 = vld [vmem:[%s4067_s13 + $0x50] sm:$0xff] }
 0x6e5   : > { %v1497_v15 = vsel %vm1472_vm13, %v1496_v7, %v1479_v58  ;;  %v659_v58 = vld [vmem:[%s4061_s7 + $0x8] sm:$0xff] }
 0x6e6   : > { %v1503_v16 = vperm.slane %v1497_v15, %v3625_v60  ;;  %v1522_v18 = vrot.slane %v1507_v12, 4  ;;  %v1524_v19 = vrot.slane %v1515_v13, 4  ;;  %v1527_v20 = vsel %vm1472_vm13, 0.0, %v1526_v14  ;;  %1619 = vmatpush.msrb.mxu1 %v659_v58  ;;  %v668_v15 = vld [vmem:[%s4065_s11 + $0x18] sm:$0xff] }
 0x6e7   : > { %v1539_v21 = vsel %vm1472_vm13, %v1526_v14, %v1515_v13  ;;  %v1544_v22 = vrot.slane %v1527_v20, 4  ;;  %1690 = vmatpush.msrb.mxu2 %v668_v15 }
 0x6e8   : > { %v1520_v23 = vrot.slane %v1503_v16, 4  ;;  %v1523_v24 = vsel %vm1472_vm13, 0.0, %v1522_v18  ;;  %v1525_v25 = vsel %vm1472_vm13, 0.0, %v1524_v19  ;;  %v1543_v26 = vperm.slane %v1539_v21, %v3619_v50  ;;  %1620 = vmatpush.msrb.mxu1 %v658_v59  ;;  %v679_v59 = vld [vmem:[%s4067_s13 + $0x48] sm:$0xff] }
 0x6e9   : > { %v1533_v27 = vrot.slane %v1523_v24, 4  ;;  %v1528_v28 = vsel %vm1472_vm13, %v1522_v18, %v1503_v16  ;;  %v1545_v29 = vsel %vm1472_vm13, %v1544_v22, %v1525_v25  ;;  %v666_v16 = vld [vmem:[%s4065_s11 + $0x8] sm:$0xff]  ;;  %v665_v18 = vld [vmem:[%s4065_s11] sm:$0xff] }
 0x6ea   : > { %v1521_v30 = vsel %vm1472_vm13, 0.0, %v1520_v23  ;;  %v1532_v31 = vperm.slane %v1528_v28, %v3619_v50  ;;  %v1549_v32 = vperm.slane %v1545_v29, %v3619_v50  ;;  %v1564_v33 = vrot.slane %v1543_v26, 4 }
 0x6eb   : > { %v1534_v34 = vsel %vm1472_vm13, %v1533_v27, %v1521_v30 }
 0x6ec   : > { %v1538_v35 = vperm.slane %v1534_v34, %v3619_v50  ;;  %v1552_v36 = vrot.slane %v1532_v31, 4  ;;  %v1565_v37 = vsel %vm1472_vm13, %v1549_v32, %v1564_v33  ;;  %v1562_v38 = vrot.slane %v1549_v32, 4 }
 0x6ed   : > { %v1573_v39 = vperm.slane %v1565_v37, %v3625_v60 }
 0x6ee   : > { %v1553_v40 = vsel %vm1472_vm13, %v1538_v35, %v1552_v36  ;;  %v1550_v41 = vrot.slane %v1538_v35, 4  ;;  %v1563_v42 = vsel %vm1472_vm13, %v1562_v38, %v1543_v26 }
 0x6ef   : > { %v1561_v43 = vperm.slane %v1553_v40, %v3625_v60  ;;  %v1578_v44 = vrot.slane %v1573_v39, 4  ;;  %v1569_v45 = vperm.slane %v1563_v42, %v3625_v60 }
 0x6f0   : > { %v1551_v46 = vsel %vm1472_vm13, %v1550_v41, %v1532_v31  ;;  %v3212_v41 = vld [vmem:[%s4063_s9] ss:$0 sm:$0xff] }
 0x6f1   : > { %v1579_v47 = vsel %vm1472_vm13, %v1578_v44, %v1561_v43  ;;  %v1580_v48 = vrot.slane %v1561_v43, 4  ;;  %v1557_v49 = vperm.slane %v1551_v46, %v3625_v60  ;;  %v1574_v51 = vrot.slane %v1569_v45, 4  ;;  %v3213_v44 = vld [vmem:[%s4064_s10] ss:$0 sm:$0xff] }
 0x6f2   : > { %1587 = vrot.lane.b32.xlu2 %v1579_v47, %s4084_s25  ;;  %v685_v47 = vld [vmem:[%s4067_s13 + $0x78] sm:$0xff]  ;;  %s4121_s25 = smov 8  }
 0x6f3   : > { %v1581_v52 = vsel %vm1472_vm13, %v1573_v39, %v1580_v48  ;;  %v1576_v53 = vrot.slane %v1557_v49, 4  ;;  %v1575_v54 = vsel %vm1472_vm13, %v1574_v51, %v1557_v49  ;;  %1741 = vmatpush.msrb.mxu3 %v685_v47  ;;  %v684_v48 = vld [vmem:[%s4067_s13 + $0x70] sm:$0xff]  ;;  %v3214_v49 = vld [vmem:[%s4066_s12] ss:$0 sm:$0xff]  ;;  %v683_v51 = vld [vmem:[%s4067_s13 + $0x68] sm:$0xff] }
 0x6f4   : > { %1591 = vrot.lane.b32.xlu1 %v1581_v52, %s4087_s24  ;;  %v682_v52 = vld [vmem:[%s4067_s13 + $0x60] sm:$0xff] }
 0x6f5   : > { %v1577_v55 = vsel %vm1472_vm13, %v1569_v45, %v1576_v53  ;;  %1742 = vmatpush.msrb.mxu3 %v684_v48 }
 0x6f6   : > { %1583 = vrot.lane.b32.xlu0 %v1577_v55, %s4090_s20  ;;  %v681_v55 = vld [vmem:[%s4067_s13 + $0x58] sm:$0xff] }
 0x6f7   : > { %1743 = vmatpush.msrb.mxu3 %v683_v51 }
 0x6f9   : > { %1744 = vmatpush.msrb.mxu3 %v682_v52 }
 0x6fb   : > { %1745 = vmatpush.msrb.mxu3 %v681_v55  ;;  %v3065_v55 = vld [vmem:[%s4112_s5 + $0x20] sm:$0xff] }
 0x6fd   : > { %1746 = vmatpush.msrb.mxu3 %v680_v57 }
 0x6ff   : > { %1747 = vmatpush.msrb.mxu3 %v679_v59 }
 0x74c   : > { %v1588_v62 = vpop.permute.xlu2 %1587 }
 0x766   : > { %v1592_v0 = vpop.permute.xlu1 %1591 }
 0x768   : > { %v1584_v61 = vpop.permute.xlu0 %1583 }
 0x769   : > { %v1594_v63 = vsel %vm914_vm9, %v1575_v54, %v1584_v61 }
 0x76a   : > { %v1596_v1 = vsel %vm1595_vm14, %v1594_v63, %v1588_v62  ;;  %v678_v62 = vld [vmem:[%s4067_s13 + $0x40] sm:$0xff] }
 0x76b   : > { %v1598_v2 = vsel %vm1597_vm15, %v1596_v1, %v1592_v0  ;;  %1748 = vmatpush.msrb.mxu3 %v678_v62  ;;  %v677_v0 = vld [vmem:[%s4067_s13 + $0x38] sm:$0xff]  ;;  %v676_v1 = vld [vmem:[%s4067_s13 + $0x30] sm:$0xff] }
 0x76c   : > { %3061 = vmatmul.msk.f32.vlgmr.msrb.gmra.mxu1 %vm687_vm1, %v1598_v2  ;;  %v675_v2 = vld [vmem:[%s4067_s13 + $0x28] sm:$0xff] }
 0x76d   : > { %1749 = vmatpush.msrb.mxu3 %v677_v0 }
 0x76f   : > { %1750 = vmatpush.msrb.mxu3 %v676_v1 }
 0x771   : > { %1751 = vmatpush.msrb.mxu3 %v675_v2 }
 0x7e9   : > { %v1622_v4 = vpop.f32.mrf.mxu1 }
 0x7ea   : > { %v1623_v5 = vadd.f32 %v3211_v3, %v1622_v4  ;;  %v674_v3 = vld [vmem:[%s4067_s13 + $0x20] sm:$0xff] }
 0x7eb   : > { %1752 = vmatpush.msrb.mxu3 %v674_v3 }
 0x7ec   : > { %v3686_v6 = vadd.f32 %v1623_v5, %v3540_v9  ;;  %v667_v9 = vld [vmem:[%s4065_s11 + $0x10] sm:$0xff]  ;;  %v673_v5 = vld [vmem:[%s4067_s13 + $0x18] sm:$0xff] }
 0x7ed   : > { %1691 = vmatpush.msrb.mxu2 %v667_v9  ;;  %1753 = vmatpush.msrb.mxu3 %v673_v5  ;;  %v670_v9 = vld [vmem:[%s4067_s13] sm:$0xff] }
 0x7ee   : > { %v1626_v7 = vsel %vm687_vm1, %v3686_v6, 0.0 }
 0x7ef   : > { %1627 = vadd.xlane.f32.xlu1 %v1626_v7  ;;  %1692 = vmatpush.msrb.mxu2 %v666_v16 }
 0x7f1   : > { %1693 = vmatpush.msrb.mxu2 %v665_v18 }
 0x862   : > { %v1628_v8 = vpop.xlane.xlu1 %1627 }
 0x863   : > { %v1629_v10 = vmul.f32 %v1628_v8, %v3544_v17  ;;  %v672_v8 = vld [vmem:[%s4067_s13 + $0x10] sm:$0xff] }
 0x864   : > { %1754 = vmatpush.msrb.mxu3 %v672_v8 }
 0x865   : > { %v1630_v12 = vsub.f32 %v3686_v6, %v1629_v10 }
 0x867   : > { %v1631_v13 = vmul.f32 %v1630_v12, %v1630_v12 }
 0x869   : > { %v1632_v14 = vsel %vm687_vm1, %v1631_v13, 0.0  ;;  %v671_v13 = vld [vmem:[%s4067_s13 + $0x8] sm:$0xff] }
 0x86a   : > { %1633 = vadd.xlane.f32.xlu2 %v1632_v14  ;;  %1755 = vmatpush.msrb.mxu3 %v671_v13 }
 0x86c   : > { %1756 = vmatpush.msrb.mxu3 %v670_v9 }
 0x8dd   : > { %v1634_v19 = vpop.xlane.xlu2 %1633 }
 0x8de   : > { %v1635_v20 = vmul.f32 %v1634_v19, %v3544_v17 }
 0x8e0   : > { %v1636_v21 = vadd.f32 1e-05, %v1635_v20 }
 0x8e2   : > { %3249 = vrsqrt.f32 %v1636_v21  ;;  %vm1644_vm0 = vcmp.eq.f32.partialorder %v1636_v21, inf  ;;  %v1647_v29 = vand.u32 2147483648, %v1636_v21  ;;  %vm1646_vm2 = vcmp.eq.f32.partialorder %v1636_v21, 0.0 }
 0x8e8   : > { %v3250_v22 = vpop.eup %3249 }
 0x8e9   : > { %v1638_v23 = vmul.f32 %v3250_v22, %v1636_v21 }
 0x8eb   : > { %v1639_v24 = vmul.f32 %v3250_v22, %v1638_v23 }
 0x8ed   : > { %v1640_v25 = vmul.f32 0.5, %v1639_v24 }
 0x8ef   : > { %v1641_v26 = vsub.f32 1.5, %v1640_v25 }
 0x8f1   : > { %v1642_v27 = vmul.f32 %v3250_v22, %v1641_v26 }
 0x8f3   : > { %v1643_v28 = vmul.f32 %v1642_v27, %v1636_v21 }
 0x8f5   : > { %v1645_v30 = vsel %vm1644_vm0, %v1636_v21, %v1643_v28 }
 0x8f6   : > { %v1648_v31 = vsel %vm1646_vm2, %v1647_v29, %v1645_v30 }
 0x8f7   : > { %3251 = vrcp.f32 %v1648_v31  ;;  %v1660_v35 = vand.u32 2147483648, %v1648_v31  ;;  %v1658_v37 = vand.u32 2147483647, %v1648_v31  ;;  %vm1654_vm4 = vweird.f32 %v1648_v31 }
 0x8f9   : > { %v1661_v39 = vor.u32 1.1754944e-38, %v1660_v35  ;;  %vm1659_vm6 = vcmp.eq.f32.partialorder %v1658_v37, 8.507059e+37 }
 0x8fd   : > { %v3252_v32 = vpop.eup %3251 }
 0x8fe   : > { %v1650_v33 = vmul.f32 %v3252_v32, %v1648_v31  ;;  %vm1655_vm3 = vweird.f32 %v3252_v32 }
 0x8ff   : > { %vm1656_vm5 = vmor %vm1654_vm4, %vm1655_vm3 }
 0x900   : > { %v1651_v34 = vsub.f32 1.0, %v1650_v33 }
 0x902   : > { %v1652_v36 = vmul.f32 %v3252_v32, %v1651_v34 }
 0x904   : > { %v1653_v38 = vadd.f32 %v3252_v32, %v1652_v36  ;;  %v3365_v36 = vmov -1.0  }
 0x906   : > { %v1657_v40 = vsel %vm1656_vm5, %v3252_v32, %v1653_v38 }
 0x907   : > { %v1662_v42 = vsel %vm1659_vm6, %v1661_v39, %v1657_v40 }
 0x908   : > { %v1663_v43 = vmul.f32 %v1662_v42, %v1630_v12  ;;  %v3215_v42 = vld [vmem:[%s4068_s14] ss:$0 sm:$0xff] }
 0x90a   : > { %v1667_v45 = vmul.f32 %v3212_v41, %v1663_v43 }
 0x90c   : > { %v1671_v46 = vadd.f32 %v3213_v44, %v1667_v45 }
 0x90e   : > { %3062 = vmatmul.msk.f32.vlgmr.msrb.gmra.mxu2 %vm687_vm1, %v1671_v46 }
 0x991   : > { %v1695_v53 = vpop.f32.mrf.mxu2 }
 0x992   : > { %v3728_v54 = vadd.f32 %v3214_v49, %v1695_v53  ;;  %v3068_v53 = vld [vmem:[%s4112_s5 + $0x38] sm:$0xff] }
 0x993   : > { %1874 = vmatpush.msrb.mxu0 %v3068_v53 }
 0x994   : > { %v1699_v56 = vmul.f32 0.70710677, %v3728_v54  ;;  %v1698_v39 = vmul.f32 0.5, %v3728_v54  ;;  %v3066_v54 = vld [vmem:[%s4112_s5 + $0x28] sm:$0xff] }
 0x996   : > { %v1702_v58 = vand.u32 2147483647, %v1699_v56  ;;  %vm1700_vm12 = vcmp.ge.f32.partialorder %v1699_v56, 0.0 }
 0x997   : > { %v1701_v37 = vsel %vm1700_vm12, 1.0, %v3365_v36 }
 0x998   : > { %v1703_v61 = vmul.f32 0.3275911, %v1702_v58  ;;  %v1729_v21 = vsub.f32 0.0, %v1702_v58 }
 0x99a   : > { %v1704_v63 = vadd.f32 1.0, %v1703_v61  ;;  %v1730_v24 = vmul.f32 %v1729_v21, %v1702_v58  ;;  %v3217_v21 = vld [vmem:[%s4115_s4 + $0x1] ss:$0 sm:$0xff] }
 0x99c   : > { %3253 = vrcp.f32 %v1704_v63  ;;  %v1716_v12 = vand.u32 2147483648, %v1704_v63  ;;  %v1714_v15 = vand.u32 2147483647, %v1704_v63  ;;  %vm1710_vm8 = vweird.f32 %v1704_v63 }
 0x99d   : > { %v1731_v27 = vmul.f32 1.442695, %v1730_v24  ;;  %v3218_v24 = vld [vmem:[%s4060_s6 + $0x1] ss:$0 sm:$0xff] }
 0x99e   : > { %v1717_v18 = vor.u32 1.1754944e-38, %v1716_v12  ;;  %vm1715_vm11 = vcmp.eq.f32.partialorder %v1714_v15, 8.507059e+37 }
 0x99f   : > { %3255 = vpow2.f32 %v1731_v27 }
 0x9a2   : > { %v3254_v4 = vpop.eup %3253 }
 0x9a3   : > { %v1706_v7 = vmul.f32 %v3254_v4, %v1704_v63  ;;  %vm1711_vm7 = vweird.f32 %v3254_v4 }
 0x9a4   : > { %vm1712_vm10 = vmor %vm1710_vm8, %vm1711_vm7 }
 0x9a5   : > { %v1707_v10 = vsub.f32 1.0, %v1706_v7  ;;  %v3256_v33 = vpop.eup %3255 }
 0x9a7   : > { %v1708_v14 = vmul.f32 %v3254_v4, %v1707_v10 }
 0x9a9   : > { %v1709_v16 = vadd.f32 %v3254_v4, %v1708_v14 }
 0x9ab   : > { %v1713_v19 = vsel %vm1712_vm10, %v3254_v4, %v1709_v16 }
 0x9ac   : > { %v1718_v20 = vsel %vm1715_vm11, %v1717_v18, %v1713_v19  ;;  %v3216_v18 = vld [vmem:[%s4114_s2 + $0x1] ss:$0 sm:$0xff] }
 0x9ad   : > { %v1720_v22 = vmul.f32 1.0614054, %v1718_v20 }
 0x9af   : > { %v1721_v23 = vadd.f32 -1.4531521, %v1720_v22 }
 0x9b1   : > { %v1722_v25 = vmul.f32 %v1721_v23, %v1718_v20 }
 0x9b3   : > { %v1723_v26 = vadd.f32 1.4214138, %v1722_v25 }
 0x9b5   : > { %v1724_v28 = vmul.f32 %v1723_v26, %v1718_v20 }
 0x9b7   : > { %v1725_v29 = vadd.f32 -0.28449672, %v1724_v28 }
 0x9b9   : > { %v1726_v30 = vmul.f32 %v1725_v29, %v1718_v20 }
 0x9bb   : > { %v1727_v31 = vadd.f32 0.2548296, %v1726_v30 }
 0x9bd   : > { %v1728_v32 = vmul.f32 %v1727_v31, %v1718_v20 }
 0x9bf   : > { %v1733_v34 = vmul.f32 %v3256_v33, %v1728_v32 }
 0x9c1   : > { %v1734_v35 = vsub.f32 1.0, %v1733_v34 }
 0x9c3   : > { %v1735_v38 = vmul.f32 %v1734_v35, %v1701_v37 }
 0x9c5   : > { %v1736_v40 = vadd.f32 1.0, %v1735_v38 }
 0x9c7   : > { %v1737_v41 = vmul.f32 %v1736_v40, %v1698_v39 }
 0x9c9   : > { %1757 = vmatmul.f32.vlgmr.msrb.gmra.mxu3 %v1737_v41 }
 0xa4c   : > { %v1758_v43 = vpop.f32.mrf.mxu3 }
 0xa4d   : > { %v1759_v44 = vadd.f32 %v3215_v42, %v1758_v43 }
 0xa4f   : > { %v3773_v45 = vadd.f32 %v1759_v44, %v3686_v6  ;;  %v3067_v6 = vld [vmem:[%s4112_s5 + $0x30] sm:$0xff] }
 0xa50   : > { %1875 = vmatpush.msrb.mxu0 %v3067_v6 }
 0xa51   : > { %v1810_v46 = vsel %vm687_vm1, %v3773_v45, 0.0 }
 0xa52   : > { %1811 = vadd.xlane.f32.xlu0 %v1810_v46  ;;  %1876 = vmatpush.msrb.mxu0 %v3066_v54 }
 0xa54   : > { %1877 = vmatpush.msrb.mxu0 %v3065_v55 }
 0xac5   : > { %v1812_v47 = vpop.xlane.xlu0 %1811 }
 0xac6   : > { %v1813_v48 = vmul.f32 %v1812_v47, %v3544_v17 }
 0xac8   : > { %v1814_v49 = vsub.f32 %v3773_v45, %v1813_v48 }
 0xaca   : > { %v1815_v51 = vmul.f32 %v1814_v49, %v1814_v49 }
 0xacc   : > { %v1816_v52 = vsel %vm687_vm1, %v1815_v51, 0.0 }
 0xacd   : > { %1817 = vadd.xlane.f32.xlu1 %v1816_v52 }
 0xb40   : > { %v1818_v56 = vpop.xlane.xlu1 %1817 }
 0xb41   : > { %v1819_v57 = vmul.f32 %v1818_v56, %v3544_v17 }
 0xb43   : > { %v1820_v58 = vadd.f32 1e-05, %v1819_v57 }
 0xb45   : > { %3257 = vrsqrt.f32 %v1820_v58  ;;  %vm1828_vm0 = vcmp.eq.f32.partialorder %v1820_v58, inf  ;;  %v1831_v3 = vand.u32 2147483648, %v1820_v58  ;;  %vm1830_vm2 = vcmp.eq.f32.partialorder %v1820_v58, 0.0 }
 0xb4b   : > { %v3258_v59 = vpop.eup %3257 }
 0xb4c   : > { %v1822_v61 = vmul.f32 %v3258_v59, %v1820_v58 }
 0xb4e   : > { %v1823_v62 = vmul.f32 %v3258_v59, %v1822_v61 }
 0xb50   : > { %v1824_v63 = vmul.f32 0.5, %v1823_v62 }
 0xb52   : > { %v1825_v0 = vsub.f32 1.5, %v1824_v63 }
 0xb54   : > { %v1826_v1 = vmul.f32 %v3258_v59, %v1825_v0 }
 0xb56   : > { %v1827_v2 = vmul.f32 %v1826_v1, %v1820_v58 }
 0xb58   : > { %v1829_v4 = vsel %vm1828_vm0, %v1820_v58, %v1827_v2 }
 0xb59   : > { %v1832_v5 = vsel %vm1830_vm2, %v1831_v3, %v1829_v4 }
 0xb5a   : > { %3259 = vrcp.f32 %v1832_v5  ;;  %v1844_v12 = vand.u32 2147483648, %v1832_v5  ;;  %v1842_v14 = vand.u32 2147483647, %v1832_v5  ;;  %vm1838_vm4 = vweird.f32 %v1832_v5 }
 0xb5c   : > { %v1845_v9 = vor.u32 1.1754944e-38, %v1844_v12  ;;  %vm1843_vm6 = vcmp.eq.f32.partialorder %v1842_v14, 8.507059e+37 }
 0xb60   : > { %v3260_v7 = vpop.eup %3259 }
 0xb61   : > { %v1834_v8 = vmul.f32 %v3260_v7, %v1832_v5  ;;  %vm1839_vm3 = vweird.f32 %v3260_v7 }
 0xb62   : > { %vm1840_vm5 = vmor %vm1838_vm4, %vm1839_vm3 }
 0xb63   : > { %v1835_v10 = vsub.f32 1.0, %v1834_v8 }
 0xb65   : > { %v1836_v13 = vmul.f32 %v3260_v7, %v1835_v10 }
 0xb67   : > { %v1837_v15 = vadd.f32 %v3260_v7, %v1836_v13 }
 0xb69   : > { %v1841_v16 = vsel %vm1840_vm5, %v3260_v7, %v1837_v15 }
 0xb6a   : > { %v1846_v19 = vsel %vm1843_vm6, %v1845_v9, %v1841_v16 }
 0xb6b   : > { %v1847_v20 = vmul.f32 %v1846_v19, %v1814_v49 }
 0xb6d   : > { %v1851_v22 = vmul.f32 %v3216_v18, %v1847_v20 }
 0xb6f   : > { %v1855_v23 = vadd.f32 %v3217_v21, %v1851_v22 }
 0xb71   : > { %3099 = vmatmul.msk.f32.vlgmr.msrb.gmra.mxu0 %vm687_vm1, %v1855_v23 }
 0xbee   : > { %v1879_v25 = vpop.f32.mrf.mxu0 }
 0xbef   : > { %v1880_v26 = vadd.f32 %v3218_v24, %v1879_v25 }
 0xbf1   : > { %1885 = vrot.lane.b32.xlu0 %v1880_v26, %s3356_s28  ;;  %1883 = vrot.lane.b32.xlu2 %v1880_v26, %s3355_s27  ;;  %s4118_s27 = smov 64   ;;  %s4119_s28 = smov 16  }
 0xbf2   : > { %1887 = vrot.lane.b32.xlu1 %v1880_v26, %s4116_s0 }
 0xbf9   : > { %1889 = vrot.lane.b32.xlu0 %v1880_v26, %s4117_s21 }
 0xc4b   : > { %v1884_v28 = vpop.permute.xlu2 %1883 }
 0xc63   : > { %v1886_v27 = vpop.permute.xlu0 %1885 }
 0xc64   : > { %v1888_v29 = vpop.permute.xlu1 %1887  ;;  %1893 = vrot.lane.b32.xlu1 %v1886_v27, %s4117_s21 }
 0xc65   : > { %v3196_v30 = vpack.i.bf16 %v1884_v28, %v1888_v29 }
 0xc67   : > { %3197 = vrot.lane.b32.xlu2 %v3196_v30, %s4117_s21  ;;  %s4123_s21 = sld [smem:[#allocation18_spill]] }
 0xc6b   : > { %v1890_v31 = vpop.permute.xlu0 %1889 }
 0xc6c   : > { %1901 = vxpose.xlu0.b32.start.end [1/1] (short) (narrow) %v1890_v31, 8 }
 0xcc1   : > { %v3198_v32 = vpop.permute.xlu2 %3197 }
 0xcc2   : > { %3202 = vxpose.xlu2.b32.start.end [1/1] (short) (narrow) %v3198_v32, 8 }
 0xcd6   : > { %v1894_v33 = vpop.permute.xlu1 %1893 }
 0xcd7   : > { %1965 = vxpose.xlu1.b32.start.end [1/1] (short) (narrow) %v1894_v33, 8 }
 0xd10   : > { %v1917_v34 = vpop.trf.xlu0 }
 0xd11   : > { %2046 = vmatpush.msra.mxu1 %v1917_v34 }
 0xd12   : > { %3100 = vmatmul.msk.f32.vlgmr.msra.gmra.mxu1 %vm914_vm9, %v1880_v26 }
 0xd5b   : > { %v3203_v35 = vpop.trf.xlu2 }
 0xd5c   : > { %v3207_v37 = vunpack.i.h.bf16 %v3203_v35  ;;  %v3204_v38 = vunpack.i.l.bf16 %v3203_v35 }
 0xd5e   : > { %2068 = vmatpush.msra.mxu2 %v3207_v37  ;;  %2112 = vmatpush.msrb.mxu1 %v3204_v38 }
 0xd5f   : > { %3101 = vmatmul.msk.f32.vlgmr.msra.gmra.mxu2 %vm914_vm9, %v1884_v28  ;;  %3103 = vmatmul.msk.f32.vlgmr.msrb.gmra.mxu1 %vm914_vm9, %v1888_v29 }
 0xd7b   : > { %v1981_v39 = vpop.trf.xlu1 }
 0xd7c   : > { %2090 = vmatpush.msra.mxu0 %v1981_v39 }
 0xd7d   : > { %3102 = vmatmul.msk.f32.vlgmr.msra.gmra.mxu0 %vm914_vm9, %v1886_v27 }
 0xd8f   : > { %v2048_v40 = vpop.f32.mrf.mxu1 }
 0xd90   : > { %v2049_v41 = vadd.f32 %v2048_v40, %v3582_v11 }
 0xd92   : > { %v2117_v42 = vsel %vm914_vm9, %v2049_v41, -inf }
 0xd93   : > { %2118 = vmax.xlane.f32.xlu0 %v2117_v42 }
 0xddc   : > { %v2114_v43 = vpop.f32.mrf.mxu1 }
 0xddd   : > { %v2115_v44 = vadd.f32 %v2114_v43, %v3582_v11 }
 0xddf   : > { %v2126_v46 = vsel %vm914_vm9, %v2115_v44, -inf }
 0xde0   : > { %2127 = vmax.xlane.f32.xlu2 %v2126_v46 }
 0xde2   : > { %v2070_v47 = vpop.f32.mrf.mxu2 }
 0xde3   : > { %v2071_v48 = vadd.f32 %v2070_v47, %v3582_v11 }
 0xde5   : > { %v2120_v49 = vsel %vm914_vm9, %v2071_v48, -inf }
 0xde6   : > { %2121 = vmax.xlane.f32.xlu0 %v2120_v49 }
 0xdf8   : > { %2213 = vrot.lane.b32.xlu2 %v1880_v26, %s4118_s27 }
 0xdfa   : > { %v2092_v51 = vpop.f32.mrf.mxu0  ;;  %2219 = vrot.lane.b32.xlu0 %v1888_v29, %s4118_s27 }
 0xdfb   : > { %v2093_v52 = vadd.f32 %v2092_v51, %v3582_v11 }
 0xdfd   : > { %v2123_v53 = vsel %vm914_vm9, %v2093_v52, -inf }
 0xdfe   : > { %2124 = vmax.xlane.f32.xlu1 %v2123_v53 }
 0xe00   : > { %2215 = vrot.lane.b32.xlu2 %v1884_v28, %s4118_s27 }
 0xe06   : > { %v2119_v6 = vpop.xlane.xlu0 %2118 }
 0xe07   : > { %v2129_v54 = vsub.f32 %v2049_v41, %v2119_v6 }
 0xe09   : > { %v2133_v55 = vmul.f32 1.442695, %v2129_v54 }
 0xe0b   : > { %3261 = vpow2.f32 %v2133_v55 }
 0xe11   : > { %v3262_v56 = vpop.eup %3261 }
 0xe12   : > { %v2141_v57 = vsel %vm914_vm9, %v3262_v56, 0.0 }
 0xe17   : > { %2217 = vrot.lane.b32.xlu1 %v1886_v27, %s4118_s27  ;;  %s2968_s27 = sshll.u32 %s2964_s26, 4  ;;  %s2969_s27 = int_to_ptr.hbm [resolvable:$true] %s2968_s27 }
 0xe18   : > { %s3303_s1 = sshra.s32 %s2969_s27, 4  ;;  %s3304_s1 = int_to_ptr.hbm [resolvable:$true] %s3303_s1 }
 0xe19   : > { %s3305_s5 = scalar_lea.hbm %s3304_s1, 8  ;;  %p3310_p0 = scmp.lt.s32.totalorder %s3304_s1, %s4073_s19 }
 0xe1a   : > { %p3306_p11 = scmp.ne.s32.totalorder %s3304_s1, %s3305_s5 }
 0xe1c   : > { %p3307_p12 = pnand %p3306_p11, %p3504_p5 }
 0xe1e   : > { %p3308_p13 = pneg %p3307_p12 }
 0xe41   : > { %2142 = vadd.xlane.f32.xlu1 %v2141_v57 }
 0xe53   : > { %v2128_v11 = vpop.xlane.xlu2 %2127 }
 0xe54   : > { %v2132_v58 = vsub.f32 %v2115_v44, %v2128_v11 }
 0xe56   : > { %v2139_v59 = vmul.f32 1.442695, %v2132_v58 }
 0xe58   : > { %3263 = vpow2.f32 %v2139_v59 }
 0xe59   : > { %v2122_v63 = vpop.xlane.xlu0 %2121 }
 0xe5a   : > { %v2130_v3 = vsub.f32 %v2071_v48, %v2122_v63 }
 0xe5b   : > { %v2214_v13 = vpop.permute.xlu2 %2213 }
 0xe5c   : > { %v2135_v5 = vmul.f32 1.442695, %v2130_v3 }
 0xe5e   : > { %v3264_v61 = vpop.eup %3263 }
 0xe5f   : > { %v2150_v62 = vsel %vm914_vm9, %v3264_v61, 0.0 }
 0xe60   : > { %2151 = vadd.xlane.f32.xlu0 %v2150_v62 }
 0xe63   : > { %v2216_v14 = vpop.permute.xlu2 %2215 }
 0xe6c   : > { %v2220_v0 = vpop.permute.xlu0 %2219 }
 0xe6d   : > { %2321 = vxpose.xlu2.b32.start.end [1/1] (short) (narrow) %v2220_v0, 8 }
 0xe71   : > { %v2125_v1 = vpop.xlane.xlu1 %2124 }
 0xe72   : > { %v2131_v2 = vsub.f32 %v2093_v52, %v2125_v1 }
 0xe74   : > { %v2137_v4 = vmul.f32 1.442695, %v2131_v2 }
 0xe76   : > { %3265 = vpow2.f32 %v2137_v4 }
 0xe77   : > { %3267 = vpow2.f32 %v2135_v5 }
 0xe7c   : > { %v3827_v7 = vpop.eup %3265 }
 0xe7d   : > { %v2147_v8 = vsel %vm914_vm9, %v3827_v7, 0.0  ;;  %v3831_v10 = vpop.eup %3267 }
 0xe7e   : > { %2148 = vadd.xlane.f32.xlu1 %v2147_v8  ;;  %v2144_v12 = vsel %vm914_vm9, %v3831_v10, 0.0 }
 0xe86   : > { %2145 = vadd.xlane.f32.xlu1 %v2144_v12 }
 0xe89   : > { %2225 = vxpose.xlu0.b32.start.end [1/1] (short) (narrow) %v2214_v13, 8  ;;  %v2218_v15 = vpop.permute.xlu1 %2217 }
 0xe91   : > { %2257 = vxpose.xlu0.b32.start.end [1/1] (short) (narrow) %v2216_v14, 8 }
 0xeb4   : > { %v2143_v9 = vpop.xlane.xlu1 %2142 }
 0xeb5   : > { %3269 = vrcp.f32 %v2143_v9  ;;  %v2164_v20 = vand.u32 2147483648, %v2143_v9  ;;  %v2162_v22 = vand.u32 2147483647, %v2143_v9  ;;  %vm2158_vm8 = vweird.f32 %v2143_v9 }
 0xeb7   : > { %v2165_v24 = vor.u32 1.1754944e-38, %v2164_v20  ;;  %vm2163_vm11 = vcmp.eq.f32.partialorder %v2162_v22, 8.507059e+37 }
 0xebb   : > { %v3270_v16 = vpop.eup %3269 }
 0xebc   : > { %v2154_v18 = vmul.f32 %v3270_v16, %v2143_v9  ;;  %vm2159_vm7 = vweird.f32 %v3270_v16 }
 0xebd   : > { %vm2160_vm10 = vmor %vm2158_vm8, %vm2159_vm7 }
 0xebe   : > { %v2155_v19 = vsub.f32 1.0, %v2154_v18 }
 0xec0   : > { %v2156_v21 = vmul.f32 %v3270_v16, %v2155_v19  ;;  %2289 = vxpose.xlu1.b32.start.end [1/1] (short) (narrow) %v2218_v15, 8 }
 0xec2   : > { %v2157_v23 = vadd.f32 %v3270_v16, %v2156_v21 }
 0xec4   : > { %v2161_v25 = vsel %vm2160_vm10, %v3270_v16, %v2157_v23 }
 0xec5   : > { %v2166_v26 = vsel %vm2163_vm11, %v2165_v24, %v2161_v25 }
 0xec6   : > { %v2167_v27 = vmul.f32 %v3262_v56, %v2166_v26 }
 0xec8   : > { %3104 = vmatpush.xpose.msk.msrb.mxu2 %vm914_vm9, %v2167_v27 }
 0xed3   : > { %v2152_v28 = vpop.xlane.xlu0 %2151 }
 0xed4   : > { %3271 = vrcp.f32 %v2152_v28  ;;  %v2209_v32 = vand.u32 2147483648, %v2152_v28  ;;  %v2207_v34 = vand.u32 2147483647, %v2152_v28  ;;  %vm2203_vm0 = vweird.f32 %v2152_v28 }
 0xed6   : > { %v2210_v37 = vor.u32 1.1754944e-38, %v2209_v32  ;;  %vm2208_vm3 = vcmp.eq.f32.partialorder %v2207_v34, 8.507059e+37 }
 0xeda   : > { %v3272_v29 = vpop.eup %3271 }
 0xedb   : > { %v2199_v30 = vmul.f32 %v3272_v29, %v2152_v28  ;;  %vm2204_vm12 = vweird.f32 %v3272_v29 }
 0xedc   : > { %vm2205_vm2 = vmor %vm2203_vm0, %vm2204_vm12 }
 0xedd   : > { %v2200_v31 = vsub.f32 1.0, %v2199_v30 }
 0xedf   : > { %v2201_v33 = vmul.f32 %v3272_v29, %v2200_v31 }
 0xee1   : > { %v2202_v35 = vadd.f32 %v3272_v29, %v2201_v33 }
 0xee3   : > { %v2206_v38 = vsel %vm2205_vm2, %v3272_v29, %v2202_v35 }
 0xee4   : > { %v2211_v39 = vsel %vm2208_vm3, %v2210_v37, %v2206_v38 }
 0xee5   : > { %v2212_v40 = vmul.f32 %v3264_v61, %v2211_v39 }
 0xee7   : > { %3110 = vmatpush.xpose.msk.msra.mxu2 %vm914_vm9, %v2212_v40 }
 0xef1   : > { %v2149_v41 = vpop.xlane.xlu1 %2148 }
 0xef2   : > { %3273 = vrcp.f32 %v2149_v41  ;;  %v2194_v47 = vand.u32 2147483648, %v2149_v41  ;;  %v2192_v49 = vand.u32 2147483647, %v2149_v41  ;;  %vm2188_vm5 = vweird.f32 %v2149_v41 }
 0xef4   : > { %v2195_v53 = vor.u32 1.1754944e-38, %v2194_v47  ;;  %vm2193_vm7 = vcmp.eq.f32.partialorder %v2192_v49, 8.507059e+37 }
 0xef8   : > { %v3274_v42 = vpop.eup %3273 }
 0xef9   : > { %v2184_v43 = vmul.f32 %v3274_v42, %v2149_v41  ;;  %v2146_v44 = vpop.xlane.xlu1 %2145  ;;  %vm2189_vm4 = vweird.f32 %v3274_v42 }
 0xefa   : > { %3275 = vrcp.f32 %v2146_v44  ;;  %vm2190_vm6 = vmor %vm2188_vm5, %vm2189_vm4  ;;  %v2179_v11 = vand.u32 2147483648, %v2146_v44  ;;  %v2177_v59 = vand.u32 2147483647, %v2146_v44  ;;  %vm2173_vm10 = vweird.f32 %v2146_v44 }
 0xefb   : > { %v2185_v46 = vsub.f32 1.0, %v2184_v43 }
 0xefc   : > { %v2180_v62 = vor.u32 1.1754944e-38, %v2179_v11  ;;  %vm2178_vm12 = vcmp.eq.f32.partialorder %v2177_v59, 8.507059e+37 }
 0xefd   : > { %v2186_v48 = vmul.f32 %v3274_v42, %v2185_v46 }
 0xeff   : > { %v2187_v51 = vadd.f32 %v3274_v42, %v2186_v48 }
 0xf00   : > { %v3276_v52 = vpop.eup %3275 }
 0xf01   : > { %v2191_v6 = vsel %vm2190_vm6, %v3274_v42, %v2187_v51  ;;  %v2169_v54 = vmul.f32 %v3276_v52, %v2146_v44  ;;  %vm2174_vm8 = vweird.f32 %v3276_v52 }
 0xf02   : > { %v2196_v55 = vsel %vm2193_vm7, %v2195_v53, %v2191_v6  ;;  %vm2175_vm11 = vmor %vm2173_vm10, %vm2174_vm8 }
 0xf03   : > { %v2170_v56 = vsub.f32 1.0, %v2169_v54  ;;  %v2197_v57 = vmul.f32 %v3827_v7, %v2196_v55 }
 0xf05   : > { %v2171_v58 = vmul.f32 %v3276_v52, %v2170_v56  ;;  %3108 = vmatpush.xpose.msk.msra.mxu1 %vm914_vm9, %v2197_v57 }
 0xf06   : > { %v2337_v4 = vpop.trf.xlu2 }
 0xf07   : > { %v2172_v61 = vadd.f32 %v3276_v52, %v2171_v58 }
 0xf09   : > { %v2176_v63 = vsel %vm2175_vm11, %v3276_v52, %v2172_v61 }
 0xf0a   : > { %v2181_v0 = vsel %vm2178_vm12, %v2180_v62, %v2176_v63 }
 0xf0b   : > { %v2182_v1 = vmul.f32 %v3831_v10, %v2181_v0 }
 0xf0d   : > { %3106 = vmatpush.xpose.msk.msrb.mxu0 %vm914_vm9, %v2182_v1 }
 0xf2d   : > { %v2241_v2 = vpop.trf.xlu0 }
 0xf2e   : > { %3105 = vmatmul.msk.f32.vlgmr.msrb.gmra.mxu2 %vm914_vm9, %v2241_v2 }
 0xf35   : > { %v2273_v3 = vpop.trf.xlu0 }
 0xf36   : > { %3107 = vmatmul.msk.f32.vlgmr.msrb.gmra.mxu0 %vm914_vm9, %v2273_v3  ;;  %3111 = vmatmul.msk.f32.vlgmr.msra.gmra.mxu2 %vm914_vm9, %v2337_v4 }
 0xf64   : > { %v2305_v5 = vpop.trf.xlu1 }
 0xf65   : > { %3109 = vmatmul.msk.f32.vlgmr.msra.gmra.mxu1 %vm914_vm9, %v2305_v5 }
 0xfb1   : > { %v2376_v7 = vpop.f32.mrf.mxu2 }
 0xfb2   : > { %2457 = vxpose.xlu0.b32.start.end [1/1] (short) (narrow) %v2376_v7, 8 }
 0xfb3   : > { %v2402_v8 = vpop.f32.mrf.mxu0 }
 0xfb9   : > { %v2454_v10 = vpop.f32.mrf.mxu2 }
 0xfba   : > { %2489 = vxpose.xlu0.b32.start.end [1/1] (short) (narrow) %v2402_v8, 8 }
 0xfe2   : > { %v2428_v12 = vpop.f32.mrf.mxu1 }
 0xfe3   : > { %2521 = vxpose.xlu2.b32.start.end [1/1] (short) (narrow) %v2428_v12, 8 }
 0xfeb   : > { %2553 = vxpose.xlu2.b32.start.end [1/1] (short) (narrow) %v2454_v10, 8 }
0x1056   : > { %v2473_v13 = vpop.trf.xlu0 }
0x1057   : > { %v2587_v14 = vrot.slane %v2473_v13, 4 }
0x105e   : > { %v2505_v16 = vpop.trf.xlu0 }
0x105f   : > { %v2599_v20 = vrot.slane %v2505_v16, 4 }
0x107c   : > { %v2537_v15 = vpop.trf.xlu2 }
0x107d   : > { %v2585_v9 = vrot.slane %v2537_v15, 4  ;;  %v2588_v18 = vsel %vm1472_vm13, %v2537_v15, %v2587_v14 }
0x107e   : > { %v2596_v21 = vperm.slane %v2588_v18, %v3619_v50 }
0x107f   : > { %v2586_v19 = vsel %vm1472_vm13, %v2585_v9, %v2473_v13 }
0x1080   : > { %v2592_v22 = vperm.slane %v2586_v19, %v3619_v50  ;;  %v2623_v26 = vrot.slane %v2596_v21, 4  ;;  %v3073_v19 = vld [vmem:[%s4061_s7 + $0x38] sm:$0xff] }
0x1081   : > { %2728 = vmatpush.msra.mxu0 %v3073_v19 }
0x1082   : > { %v2611_v29 = vrot.slane %v2592_v22, 4 }
0x1084   : > { %v2569_v23 = vpop.trf.xlu2 }
0x1085   : > { %v2597_v24 = vrot.slane %v2569_v23, 4  ;;  %v2600_v25 = vsel %vm1472_vm13, %v2569_v23, %v2599_v20  ;;  %v3071_v20 = vld [vmem:[%s4061_s7 + $0x28] sm:$0xff] }
0x1086   : > { %v2608_v27 = vperm.slane %v2600_v25, %v3619_v50 }
0x1087   : > { %v2598_v28 = vsel %vm1472_vm13, %v2597_v24, %v2505_v16 }
0x1088   : > { %v2604_v30 = vperm.slane %v2598_v28, %v3619_v50  ;;  %v2621_v31 = vrot.slane %v2608_v27, 4  ;;  %v2624_v32 = vsel %vm1472_vm13, %v2608_v27, %v2623_v26  ;;  %v3219_v28 = vld [vmem:[%s4062_s8 + $0x1] ss:$0 sm:$0xff] }
0x1089   : > { %v2632_v33 = vperm.slane %v2624_v32, %v3625_v60 }
0x108a   : > { %v2609_v34 = vrot.slane %v2604_v30, 4  ;;  %v2612_v35 = vsel %vm1472_vm13, %v2604_v30, %v2611_v29  ;;  %v2622_v37 = vsel %vm1472_vm13, %v2621_v31, %v2596_v21  ;;  %v3070_v21 = vld [vmem:[%s4061_s7 + $0x20] sm:$0xff] }
0x108b   : > { %v2620_v38 = vperm.slane %v2612_v35, %v3625_v60  ;;  %v2628_v39 = vperm.slane %v2622_v37, %v3625_v60  ;;  %v2639_v40 = vrot.slane %v2632_v33, 4 }
0x108c   : > { %v2610_v41 = vsel %vm1472_vm13, %v2609_v34, %v2592_v22 }
0x108d   : > { %v2616_v42 = vperm.slane %v2610_v41, %v3625_v60  ;;  %v2635_v43 = vrot.slane %v2620_v38, 4  ;;  %v2637_v44 = vrot.slane %v2628_v39, 4  ;;  %v2640_v46 = vsel %vm1472_vm13, 0.0, %v2639_v40  ;;  %v3077_v41 = vld [vmem:[%s4065_s11 + $0x20] sm:$0xff] }
0x108e   : > { %v2652_v47 = vsel %vm1472_vm13, %v2639_v40, %v2628_v39  ;;  %v2657_v48 = vrot.slane %v2640_v46, 4  ;;  %v3080_v39 = vld [vmem:[%s4065_s11 + $0x38] sm:$0xff]  ;;  %v3078_v40 = vld [vmem:[%s4065_s11 + $0x28] sm:$0xff] }
0x108f   : > { %v2633_v49 = vrot.slane %v2616_v42, 4  ;;  %v2636_v51 = vsel %vm1472_vm13, 0.0, %v2635_v43  ;;  %v2638_v52 = vsel %vm1472_vm13, 0.0, %v2637_v44  ;;  %v2656_v53 = vperm.slane %v2652_v47, %v3619_v50  ;;  %2801 = vmatpush.msrb.mxu1 %v3080_v39 }
0x1090   : > { %v2646_v6 = vrot.slane %v2636_v51, 4  ;;  %v2641_v54 = vsel %vm1472_vm13, %v2635_v43, %v2616_v42  ;;  %v2658_v55 = vsel %vm1472_vm13, %v2657_v48, %v2638_v52 }
0x1091   : > { %v2634_v56 = vsel %vm1472_vm13, 0.0, %v2633_v49  ;;  %v2645_v57 = vperm.slane %v2641_v54, %v3619_v50  ;;  %v2662_v11 = vperm.slane %v2658_v55, %v3619_v50  ;;  %v2677_v58 = vrot.slane %v2656_v53, 4 }
0x1092   : > { %v2647_v59 = vsel %vm1472_vm13, %v2646_v6, %v2634_v56 }
0x1093   : > { %v2651_v61 = vperm.slane %v2647_v59, %v3619_v50  ;;  %v2665_v62 = vrot.slane %v2645_v57, 4  ;;  %v2678_v63 = vsel %vm1472_vm13, %v2662_v11, %v2677_v58  ;;  %v2675_v0 = vrot.slane %v2662_v11, 4 }
0x1094   : > { %v2686_v1 = vperm.slane %v2678_v63, %v3625_v60 }
0x1095   : > { %v2666_v2 = vsel %vm1472_vm13, %v2651_v61, %v2665_v62  ;;  %v2663_v3 = vrot.slane %v2651_v61, 4  ;;  %v2676_v4 = vsel %vm1472_vm13, %v2675_v0, %v2656_v53 }
0x1096   : > { %v2674_v5 = vperm.slane %v2666_v2, %v3625_v60  ;;  %v2691_v7 = vrot.slane %v2686_v1, 4  ;;  %v2682_v8 = vperm.slane %v2676_v4, %v3625_v60  ;;  %v3221_v4 = vld [vmem:[%s4064_s10 + $0x1] ss:$0 sm:$0xff] }
0x1097   : > { %v2664_v12 = vsel %vm1472_vm13, %v2663_v3, %v2645_v57 }
0x1098   : > { %v2692_v50 = vsel %vm1472_vm13, %v2691_v7, %v2674_v5  ;;  %v2693_v10 = vrot.slane %v2674_v5, 4  ;;  %v2670_v13 = vperm.slane %v2664_v12, %v3625_v60  ;;  %v2687_v14 = vrot.slane %v2682_v8, 4  ;;  %v3072_v60 = vld [vmem:[%s4061_s7 + $0x30] sm:$0xff] }
0x1099   : > { %2700 = vrot.lane.b32.xlu0 %v2692_v50, %s4119_s28  ;;  %2729 = vmatpush.msra.mxu0 %v3072_v60  ;;  %v3096_v12 = vld [vmem:[%s4067_s13 + $0xf0] sm:$0xff]  ;;  %v3222_v50 = vld [vmem:[%s4066_s12 + $0x1] ss:$0 sm:$0xff]  ;;  %v3091_v60 = vld [vmem:[%s4067_s13 + $0xc8] sm:$0xff] }
0x109a   : > { %v2694_v15 = vsel %vm1472_vm13, %v2686_v1, %v2693_v10  ;;  %v2689_v9 = vrot.slane %v2670_v13, 4  ;;  %v2688_v16 = vsel %vm1472_vm13, %v2687_v14, %v2670_v13  ;;  %v3220_v1 = vld [vmem:[%s4063_s9 + $0x1] ss:$0 sm:$0xff]  ;;  %v3095_v10 = vld [vmem:[%s4067_s13 + $0xe8] sm:$0xff] }
0x109b   : > { %2704 = vrot.lane.b32.xlu1 %v2694_v15, %s4120_s23  ;;  %2730 = vmatpush.msra.mxu0 %v3071_v20  ;;  %v3094_v13 = vld [vmem:[%s4067_s13 + $0xe0] sm:$0xff]  ;;  %s604_s23 = sand.u32 1, %s3343_s30  }
0x109c   : > { %v2690_v18 = vsel %vm1472_vm13, %v2682_v8, %v2689_v9  ;;  %v3097_v8 = vld [vmem:[%s4067_s13 + $0xf8] sm:$0xff]  ;;  %s2954_s28 = scalar_lea.sflag [#allocation3], %s604_s23 }
0x109d   : > { %2696 = vrot.lane.b32.xlu2 %v2690_v18, %s4121_s25  ;;  %2731 = vmatpush.msra.mxu0 %v3070_v21  ;;  %v3093_v9 = vld [vmem:[%s4067_s13 + $0xd8] sm:$0xff]  ;;  %v3092_v18 = vld [vmem:[%s4067_s13 + $0xd0] sm:$0xff]  ;;  %v3090_v21 = vld [vmem:[%s4067_s13 + $0xc0] sm:$0xff]  ;;  %s3044_s25 = sshll.u32 %s604_s23, 3 }
0x109e   : > { %2852 = vmatpush.msrb.mxu2 %v3097_v8  ;;  %s606_s2 = scalar_lea.vmem [#allocation2], %s3044_s25  ;;  %s3309_s25 = scalar_lea.hbm %s4073_s19, 16 }
0x109f   : > { %s2966_s4 = sshll.u32 %s606_s2, 4  ;;  %p3311_p1 = scmp.lt.s32.totalorder %s3309_s25, %s3305_s5  ;;  %s2967_s4 = int_to_ptr.vmem [resolvable:$true] %s2966_s4 }
0x10a0   : > { %2853 = vmatpush.msrb.mxu2 %v3096_v12  ;;  %v2924_v12 = vld [vmem:[%s4071_s17 + $0x18] sm:$0xff] }
0x10a1   : > { %2944 = vmatpush.msra.mxu3 %v2924_v12  ;;  %p3312_p2 = por %p3311_p1, %p3310_p0 }
0x10a2   : > { %2854 = vmatpush.msrb.mxu2 %v3095_v10  ;;  %v2921_v10 = vld [vmem:[%s4071_s17] sm:$0xff] }
0x10a3   : > { %p3313_p3 = pnand %p3312_p2, %p3308_p13 }
0x10a4   : > { %2855 = vmatpush.msrb.mxu2 %v3094_v13 }
0x10a6   : > { %2856 = vmatpush.msrb.mxu2 %v3093_v9 }
0x10a8   : > { %2857 = vmatpush.msrb.mxu2 %v3092_v18 }
0x10aa   : > { %2858 = vmatpush.msrb.mxu2 %v3091_v60 }
0x10ac   : > { %2859 = vmatpush.msrb.mxu2 %v3090_v21 }
0x10f7   : > { %v2697_v22 = vpop.permute.xlu2 %2696 }
0x10f8   : > { %v2707_v23 = vsel %vm914_vm9, %v2688_v16, %v2697_v22 }
0x110b   : > { %v2701_v24 = vpop.permute.xlu0 %2700 }
0x110c   : > { %v2708_v25 = vsel %vm1595_vm14, %v2707_v23, %v2701_v24  ;;  %v3089_v23 = vld [vmem:[%s4067_s13 + $0xb8] sm:$0xff]  ;;  %v3088_v24 = vld [vmem:[%s4067_s13 + $0xb0] sm:$0xff] }
0x110d   : > { %v2705_v26 = vpop.permute.xlu1 %2704  ;;  %2860 = vmatpush.msrb.mxu2 %v3089_v23 }
0x110e   : > { %v2709_v27 = vsel %vm1597_vm15, %v2708_v25, %v2705_v26  ;;  %v3087_v25 = vld [vmem:[%s4067_s13 + $0xa8] sm:$0xff]  ;;  %v3086_v26 = vld [vmem:[%s4067_s13 + $0xa0] sm:$0xff] }
0x110f   : > { %3112 = vmatmul.msk.f32.vlgmr.msra.gmra.mxu0 %vm687_vm1, %v2709_v27  ;;  %2861 = vmatpush.msrb.mxu2 %v3088_v24 }
0x1111   : > { %2862 = vmatpush.msrb.mxu2 %v3087_v25 }
0x1113   : > { %2863 = vmatpush.msrb.mxu2 %v3086_v26 }
0x118c   : > { %v2733_v29 = vpop.f32.mrf.mxu0 }
0x118d   : > { %v2734_v30 = vadd.f32 %v3219_v28, %v2733_v29  ;;  %v3085_v28 = vld [vmem:[%s4067_s13 + $0x98] sm:$0xff] }
0x118e   : > { %2864 = vmatpush.msrb.mxu2 %v3085_v28 }
0x118f   : > { %v3908_v31 = vadd.f32 %v2734_v30, %v3773_v45  ;;  %v3079_v45 = vld [vmem:[%s4065_s11 + $0x30] sm:$0xff] }
0x1190   : > { %2802 = vmatpush.msrb.mxu1 %v3079_v45  ;;  %v3084_v30 = vld [vmem:[%s4067_s13 + $0x90] sm:$0xff] }
0x1191   : > { %v2737_v32 = vsel %vm687_vm1, %v3908_v31, 0.0  ;;  %2865 = vmatpush.msrb.mxu2 %v3084_v30 }
0x1192   : > { %2738 = vadd.xlane.f32.xlu1 %v2737_v32  ;;  %2803 = vmatpush.msrb.mxu1 %v3078_v40 }
0x1194   : > { %2804 = vmatpush.msrb.mxu1 %v3077_v41 }
0x1205   : > { %v2739_v33 = vpop.xlane.xlu1 %2738 }
0x1206   : > { %v2740_v34 = vmul.f32 %v2739_v33, %v3544_v17 }
0x1208   : > { %v2741_v35 = vsub.f32 %v3908_v31, %v2740_v34  ;;  %v3083_v34 = vld [vmem:[%s4067_s13 + $0x88] sm:$0xff] }
0x1209   : > { %2866 = vmatpush.msrb.mxu2 %v3083_v34  ;;  %v3224_v34 = vld [vmem:[%s4069_s15] ss:$0 sm:$0xff] }
0x120a   : > { %v2742_v37 = vmul.f32 %v2741_v35, %v2741_v35 }
0x120c   : > { %v2743_v38 = vsel %vm687_vm1, %v2742_v37, 0.0 }
0x120d   : > { %2744 = vadd.xlane.f32.xlu2 %v2743_v38  ;;  %v3082_v38 = vld [vmem:[%s4067_s13 + $0x80] sm:$0xff] }
0x120e   : > { %2867 = vmatpush.msrb.mxu2 %v3082_v38  ;;  %v3225_v38 = vld [vmem:[%s4070_s16] ss:$0 sm:$0xff] }
0x1280   : > { %v2745_v42 = vpop.xlane.xlu2 %2744 }
0x1281   : > { %v2746_v43 = vmul.f32 %v2745_v42, %v3544_v17 }
0x1283   : > { %v2747_v44 = vadd.f32 1e-05, %v2746_v43 }
0x1285   : > { %3277 = vrsqrt.f32 %v2747_v44  ;;  %vm2755_vm9 = vcmp.eq.f32.partialorder %v2747_v44, inf  ;;  %v2758_v6 = vand.u32 2147483648, %v2747_v44  ;;  %vm2757_vm13 = vcmp.eq.f32.partialorder %v2747_v44, 0.0 }
0x128b   : > { %v3278_v46 = vpop.eup %3277 }
0x128c   : > { %v2749_v47 = vmul.f32 %v3278_v46, %v2747_v44 }
0x128e   : > { %v2750_v48 = vmul.f32 %v3278_v46, %v2749_v47 }
0x1290   : > { %v2751_v49 = vmul.f32 0.5, %v2750_v48 }
0x1292   : > { %v2752_v51 = vsub.f32 1.5, %v2751_v49 }
0x1294   : > { %v2753_v52 = vmul.f32 %v3278_v46, %v2752_v51 }
0x1296   : > { %v2754_v53 = vmul.f32 %v2753_v52, %v2747_v44 }
0x1298   : > { %v2756_v54 = vsel %vm2755_vm9, %v2747_v44, %v2754_v53 }
0x1299   : > { %v2759_v55 = vsel %vm2757_vm13, %v2758_v6, %v2756_v54 }
0x129a   : > { %3279 = vrcp.f32 %v2759_v55  ;;  %v2771_v58 = vand.u32 2147483648, %v2759_v55  ;;  %v2769_v61 = vand.u32 2147483647, %v2759_v55  ;;  %vm2765_vm15 = vweird.f32 %v2759_v55 }
0x129c   : > { %v2772_v63 = vor.u32 1.1754944e-38, %v2771_v58  ;;  %vm2770_vm2 = vcmp.eq.f32.partialorder %v2769_v61, 8.507059e+37 }
0x12a0   : > { %v3280_v56 = vpop.eup %3279 }
0x12a1   : > { %v2761_v57 = vmul.f32 %v3280_v56, %v2759_v55  ;;  %vm2766_vm14 = vweird.f32 %v3280_v56 }
0x12a2   : > { %vm2767_vm0 = vmor %vm2765_vm15, %vm2766_vm14 }
0x12a3   : > { %v2762_v11 = vsub.f32 1.0, %v2761_v57 }
0x12a5   : > { %v2763_v59 = vmul.f32 %v3280_v56, %v2762_v11 }
0x12a7   : > { %v2764_v62 = vadd.f32 %v3280_v56, %v2763_v59 }
0x12a9   : > { %v2768_v0 = vsel %vm2767_vm0, %v3280_v56, %v2764_v62 }
0x12aa   : > { %v2773_v2 = vsel %vm2770_vm2, %v2772_v63, %v2768_v0  ;;  %v3223_v63 = vld [vmem:[%s4068_s14 + $0x1] ss:$0 sm:$0xff] }
0x12ab   : > { %v2774_v3 = vmul.f32 %v2773_v2, %v2741_v35 }
0x12ad   : > { %v2778_v5 = vmul.f32 %v3220_v1, %v2774_v3 }
0x12af   : > { %v2782_v7 = vadd.f32 %v3221_v4, %v2778_v5 }
0x12b1   : > { %3113 = vmatmul.msk.f32.vlgmr.msrb.gmra.mxu1 %vm687_vm1, %v2782_v7 }
0x132e   : > { %v2806_v14 = vpop.f32.mrf.mxu1 }
0x132f   : > { %v3950_v15 = vadd.f32 %v3222_v50, %v2806_v14  ;;  %v2923_v50 = vld [vmem:[%s4071_s17 + $0x10] sm:$0xff] }
0x1330   : > { %2945 = vmatpush.msra.mxu3 %v2923_v50 }
0x1331   : > { %v2810_v16 = vmul.f32 0.70710677, %v3950_v15  ;;  %v2809_v59 = vmul.f32 0.5, %v3950_v15 }
0x1333   : > { %v2813_v19 = vand.u32 2147483647, %v2810_v16  ;;  %vm2811_vm7 = vcmp.ge.f32.partialorder %v2810_v16, 0.0 }
0x1334   : > { %v2812_v11 = vsel %vm2811_vm7, 1.0, %v3365_v36 }
0x1335   : > { %v2814_v20 = vmul.f32 0.3275911, %v2813_v19  ;;  %v2840_v42 = vsub.f32 0.0, %v2813_v19 }
0x1337   : > { %v2815_v22 = vadd.f32 1.0, %v2814_v20  ;;  %v2841_v46 = vmul.f32 %v2840_v42, %v2813_v19 }
0x1339   : > { %3281 = vrcp.f32 %v2815_v22  ;;  %v2827_v33 = vand.u32 2147483648, %v2815_v22  ;;  %v2825_v37 = vand.u32 2147483647, %v2815_v22  ;;  %vm2821_vm4 = vweird.f32 %v2815_v22 }
0x133a   : > { %v2842_v49 = vmul.f32 1.442695, %v2841_v46 }
0x133b   : > { %v2828_v45 = vor.u32 1.1754944e-38, %v2827_v33  ;;  %vm2826_vm6 = vcmp.eq.f32.partialorder %v2825_v37, 8.507059e+37 }
0x133c   : > { %3283 = vpow2.f32 %v2842_v49 }
0x133f   : > { %v3282_v27 = vpop.eup %3281 }
0x1340   : > { %v2817_v29 = vmul.f32 %v3282_v27, %v2815_v22  ;;  %vm2822_vm3 = vweird.f32 %v3282_v27 }
0x1341   : > { %vm2823_vm5 = vmor %vm2821_vm4, %vm2822_vm3 }
0x1342   : > { %v2818_v32 = vsub.f32 1.0, %v2817_v29  ;;  %v3284_v55 = vpop.eup %3283 }
0x1344   : > { %v2819_v35 = vmul.f32 %v3282_v27, %v2818_v32 }
0x1346   : > { %v2820_v39 = vadd.f32 %v3282_v27, %v2819_v35 }
0x1348   : > { %v2824_v40 = vsel %vm2823_vm5, %v3282_v27, %v2820_v39 }
0x1349   : > { %v2829_v41 = vsel %vm2826_vm6, %v2828_v45, %v2824_v40  ;;  %v3226_v40 = vld [vmem:[%s4123_s21] ss:$0 sm:$0xff] }
0x134a   : > { %v2831_v43 = vmul.f32 1.0614054, %v2829_v41 }
0x134c   : > { %v2832_v44 = vadd.f32 -1.4531521, %v2831_v43 }
0x134e   : > { %v2833_v47 = vmul.f32 %v2832_v44, %v2829_v41 }
0x1350   : > { %v2834_v48 = vadd.f32 1.4214138, %v2833_v47 }
0x1352   : > { %v2835_v51 = vmul.f32 %v2834_v48, %v2829_v41 }
0x1354   : > { %v2836_v52 = vadd.f32 -0.28449672, %v2835_v51 }
0x1356   : > { %v2837_v53 = vmul.f32 %v2836_v52, %v2829_v41 }
0x1358   : > { %v2838_v6 = vadd.f32 0.2548296, %v2837_v53 }
0x135a   : > { %v2839_v54 = vmul.f32 %v2838_v6, %v2829_v41 }
0x135c   : > { %v2844_v56 = vmul.f32 %v3284_v55, %v2839_v54 }
0x135e   : > { %v2845_v57 = vsub.f32 1.0, %v2844_v56 }
0x1360   : > { %v2846_v58 = vmul.f32 %v2845_v57, %v2812_v11 }
0x1362   : > { %v2847_v61 = vadd.f32 1.0, %v2846_v58 }
0x1364   : > { %v2848_v62 = vmul.f32 %v2847_v61, %v2809_v59 }
0x1366   : > { %2868 = vmatmul.f32.vlgmr.msrb.gmra.mxu2 %v2848_v62 }
0x13e9   : > { %v2869_v0 = vpop.f32.mrf.mxu2 }
0x13ea   : > { %v2870_v1 = vadd.f32 %v3223_v63, %v2869_v0 }
0x13ec   : > { %v2872_v2 = vadd.f32 %v2870_v1, %v3908_v31  ;;  %v2922_v31 = vld [vmem:[%s4071_s17 + $0x8] sm:$0xff] }
0x13ed   : > { %2946 = vmatpush.msra.mxu3 %v2922_v31 }
0x13ee   : > { %v2875_v3 = vsel %vm687_vm1, %v2872_v2, 0.0 }
0x13ef   : > { %2876 = vadd.xlane.f32.xlu0 %v2875_v3  ;;  %2947 = vmatpush.msra.mxu3 %v2921_v10 }
0x1462   : > { %v2877_v4 = vpop.xlane.xlu0 %2876 }
0x1463   : > { %v2878_v36 = vmul.f32 %v2877_v4, %v3544_v17 }
0x1465   : > { %v2879_v5 = vsub.f32 %v2872_v2, %v2878_v36 }
0x1467   : > { %v2880_v7 = vmul.f32 %v2879_v5, %v2879_v5 }
0x1469   : > { %v2881_v8 = vsel %vm687_vm1, %v2880_v7, 0.0 }
0x146a   : > { %2882 = vadd.xlane.f32.xlu2 %v2881_v8 }
0x14dd   : > { %v2883_v13 = vpop.xlane.xlu2 %2882 }
0x14de   : > { %v2884_v14 = vmul.f32 %v2883_v13, %v3544_v17 }
0x14e0   : > { %v2885_v15 = vadd.f32 1e-05, %v2884_v14 }
0x14e2   : > { %3285 = vrsqrt.f32 %v2885_v15  ;;  %vm2893_vm8 = vcmp.eq.f32.partialorder %v2885_v15, inf  ;;  %v2896_v22 = vand.u32 2147483648, %v2885_v15  ;;  %vm2895_vm10 = vcmp.eq.f32.partialorder %v2885_v15, 0.0 }
0x14e8   : > { %v3286_v9 = vpop.eup %3285 }
0x14e9   : > { %v2887_v16 = vmul.f32 %v3286_v9, %v2885_v15 }
0x14eb   : > { %v2888_v18 = vmul.f32 %v3286_v9, %v2887_v16 }
0x14ed   : > { %v2889_v19 = vmul.f32 0.5, %v2888_v18 }
0x14ef   : > { %v2890_v60 = vsub.f32 1.5, %v2889_v19 }
0x14f1   : > { %v2891_v20 = vmul.f32 %v3286_v9, %v2890_v60 }
0x14f3   : > { %v2892_v21 = vmul.f32 %v2891_v20, %v2885_v15 }
0x14f5   : > { %v2894_v23 = vsel %vm2893_vm8, %v2885_v15, %v2892_v21 }
0x14f6   : > { %v2897_v24 = vsel %vm2895_vm10, %v2896_v22, %v2894_v23 }
0x14f7   : > { %3287 = vrcp.f32 %v2897_v24  ;;  %v2909_v28 = vand.u32 2147483648, %v2897_v24  ;;  %v2907_v29 = vand.u32 2147483647, %v2897_v24  ;;  %vm2903_vm12 = vweird.f32 %v2897_v24 }
0x14f9   : > { %v2910_v32 = vor.u32 1.1754944e-38, %v2909_v28  ;;  %vm2908_vm13 = vcmp.eq.f32.partialorder %v2907_v29, 8.507059e+37 }
0x14fd   : > { %v3288_v25 = vpop.eup %3287 }
0x14fe   : > { %v2899_v26 = vmul.f32 %v3288_v25, %v2897_v24  ;;  %vm2904_vm11 = vweird.f32 %v3288_v25 }
0x14ff   : > { %vm2905_vm9 = vmor %vm2903_vm12, %vm2904_vm11 }
0x1500   : > { %v2900_v27 = vsub.f32 1.0, %v2899_v26 }
0x1502   : > { %v2901_v17 = vmul.f32 %v3288_v25, %v2900_v27 }
0x1504   : > { %v2902_v30 = vadd.f32 %v3288_v25, %v2901_v17 }
0x1506   : > { %v2906_v33 = vsel %vm2905_vm9, %v3288_v25, %v2902_v30 }
0x1507   : > { %v2911_v35 = vsel %vm2908_vm13, %v2910_v32, %v2906_v33 }
0x1508   : > { %v2912_v37 = vmul.f32 %v2911_v35, %v2879_v5 }
0x150a   : > { %v2916_v39 = vmul.f32 %v3224_v34, %v2912_v37 }
0x150c   : > { %v2920_v45 = vadd.f32 %v3225_v38, %v2916_v39 }
0x150e   : > { %3114 = vmatmul.msk.f32.vlgmr.msra.gmra.mxu3 %vm687_vm1, %v2920_v45 }
0x1591   : > { %v2949_v41 = vpop.f32.mrf.mxu3 }
0x1592   : > { %v2950_v42 = vadd.f32 %v3226_v40, %v2949_v41 }
0x1594   : > { %2952 = vst.msk [vmem:[%s606_s2] sm:$0xff] %vm687_vm1, %v2950_v42 }
0x1595   : > { %3316 = shalt.err (!%p3313_p3)
}
0x1596   : > { %3119 = dma.vmem_to_hbm [thread:$0]  (%p3504_p5), %s2967_s4, 128, %s2969_s27, %s2954_s28  }
0x1597 PF: > { %s4124_s2 = sld [smem:[#allocation7_spill]] }
0x1598   : > { %s4125_s23 = sld [smem:[#allocation5_spill]] }
0x159d   : > { %p3125_p4 = scmp.ge.s32.totalorder %s4124_s2, 2 }
0x159e   : > { %s2980_s0 = sand.u32 1, %s4125_s23  }
0x159f   : > { %p3122_p7 = pnand %p3125_p4, %p3508_p6  ;;  %s2981_s21 = scalar_lea.sflag [#allocation3], %s2980_s0 }
0x15a1   : > { %p3123_p8 = pneg %p3122_p7 }
0x15a3   : > { %3334 = dma.done.wait (%p3123_p8), %s2981_s21, 128  }
0x15a4   : > { %3336 = vsyncadd (%p3123_p8), %s2981_s21, 4294967168  ;;  %s4127_s21 = sld [smem:[#allocation8_spill]]  ;;  %s4130_s0 = smov %s3343_s30 }
0x15a5   : > { %s4128_s5 = sld [smem:[#allocation6_spill]] }
0x15a6   : > { %s4129_s20 = sld [smem:[#allocation9_spill]] }
0x15aa   : > { %p29_p9 = scmp.ge.s32.totalorder %s4127_s21, 4  }
0x15ab   : > { %s4131_s30 = smov %s4128_s5 }
0x15ac   :  { %31 = sbr.rel (!%p29_p9) target bundleno = 11 (0xb), region = 146 }
0x15b1   :  { %2987 = vsyncpa [#allocation3], 1 }
0x15b2   :  { %2989 = vsyncpa [#allocation3 + $0x1], 1 }

</bundles_post_ra>
